<compile_context>
chip_gen: v7x
topology: tpu7x:2x2x1
jax: 0.10.0
libtpu: 0.0.40
codegen_flags: <defaults>
</compile_context>

<pallas_src>
import jax
import jax.numpy as jnp
from jax import lax
from jax.experimental import pallas as pl
from jax.experimental.pallas import tpu as pltpu

EMBEDDING_DIM = 128
FEEDFORWARD_DIM = 512

_SQRT_HALF = 0.7071067811865476


def _ffn_kernel(x_ref, w1_ref, b1_ref, w2_ref, b2_ref, o_ref):
    # x_ref : (tm, D)  bf16 activation row tile
    # w1_ref: (D, F)   bf16 fc1 weight (pre-transposed in the wrapper), VMEM-resident
    # b1_ref: (1, F)   f32 fc1 bias
    # w2_ref: (F, D)   bf16 fc2 weight (pre-transposed in the wrapper), VMEM-resident
    # b2_ref: (1, D)   f32 fc2 bias
    # o_ref : (tm, D)  output row tile (input dtype)

    # fc1: canonical contraction (x last dim vs w1 first dim) -> (tm, F), f32 accumulate.
    h = jnp.dot(x_ref[...], w1_ref[...], preferred_element_type=jnp.float32)
    h = h + b1_ref[...]

    # Exact erf-based GELU (torch.nn.GELU() default), kept in f32 for portability
    # (v5e has no bf16 VALU).  TODO(synk): on v6e/v7x a bf16 / tanh-approx GELU would
    # move this off the f32 VALU path if bit-exactness vs torch's erf GELU is waived.
    g = 0.5 * h * (1.0 + lax.erf(h * jnp.float32(_SQRT_HALF)))

    # TODO(synk): nn.Dropout(p=0.2) is a training-time op; eval-mode forward is identity.

    # fc2: canonical contraction -> (tm, D), f32 accumulate.
    out = jnp.dot(g.astype(w2_ref.dtype), w2_ref[...], preferred_element_type=jnp.float32)
    out = out + b2_ref[...]

    o_ref[...] = out.astype(o_ref.dtype)


def _round_up(a, b):
    return ((a + b - 1) // b) * b


def feedforward_pallas(x, w1, b1, w2, b2, *, tm=1024, matmul_dtype=jnp.bfloat16):
    """x: (batch, seq, D).  w1: (F, D), b1: (F,), w2: (D, F), b2: (D,)  (PyTorch layout).

    Inference-mode forward only (dropout is the identity).  MXU operands (activations,
    weights, GELU output) are rounded to bfloat16 with f32 accumulation; expect bf16-level
    error (~1e-2 relative) vs a pure-f32 reference.
    """
    batch, seq, D = x.shape
    F = w1.shape[0]
    M = batch * seq

    # Row tile: as large as possible (amortize per-grid-step overhead, fill the MXU's
    # M side) but never much larger than M.  Rounded to a multiple of 256 so the M side
    # is an integral number of MXU passes on v6e/v7x (and of 128 on v5e).
    tm_eff = max(min(int(tm), _round_up(M, 256)), 256)

    M_pad = _round_up(M, tm_eff)
    x2d = x.reshape(M, D).astype(matmul_dtype)      # stream activations as bf16
    if M_pad != M:
        x2d = jnp.pad(x2d, ((0, M_pad - M), (0, 0)))

    # One-time weight transpose + cast in XLA (tiny, constant-ish data); the kernel then
    # uses canonical contractions and never transposes the resident tiles per step.
    w1t = w1.T.astype(matmul_dtype)                 # (D, F)
    w2t = w2.T.astype(matmul_dtype)                 # (F, D)
    b1r = b1.reshape(1, F).astype(jnp.float32)
    b2r = b2.reshape(1, D).astype(jnp.float32)

    grid = (M_pad // tm_eff,)

    cost = pl.CostEstimate(
        flops=4 * M_pad * D * F,            # two matmuls, 2*M*D*F flops each
        transcendentals=M_pad * F,          # erf per fc1 activation
        bytes_accessed=(x2d.size * x2d.dtype.itemsize
                        + M_pad * D * x.dtype.itemsize     # output
                        + w1t.size * w1t.dtype.itemsize
                        + w2t.size * w2t.dtype.itemsize
                        + b1r.size * 4 + b2r.size * 4),
    )

    # Constant-index blocks are never re-DMA'd; drop them to a single buffer.
    resident = dict(pipeline_mode=pl.Buffered(1))

    out2d = pl.pallas_call(
        _ffn_kernel,
        out_shape=jax.ShapeDtypeStruct((M_pad, D), x.dtype),
        grid_spec=pltpu.PrefetchScalarGridSpec(
            num_scalar_prefetch=0,
            grid=grid,
            in_specs=[
                pl.BlockSpec((tm_eff, D), lambda i: (i, 0)),          # x row tile (bf16)
                pl.BlockSpec((D, F), lambda i: (0, 0), **resident),   # fc1 weight (resident)
                pl.BlockSpec((1, F), lambda i: (0, 0), **resident),   # fc1 bias
                pl.BlockSpec((F, D), lambda i: (0, 0), **resident),   # fc2 weight (resident)
                pl.BlockSpec((1, D), lambda i: (0, 0), **resident),   # fc2 bias
            ],
            out_specs=pl.BlockSpec((tm_eff, D), lambda i: (i, 0)),
        ),
        compiler_params=pltpu.CompilerParams(
            dimension_semantics=("parallel",),
            vmem_limit_bytes=32 * 1024 * 1024,
        ),
        cost_estimate=cost,
    )(x2d, w1t, b1r, w2t, b2r)

    return out2d[:M].reshape(batch, seq, D)


def feedforward_ref(x, w1, b1, w2, b2, matmul_dtype=jnp.float32):
    """Pure-JAX reference of the PyTorch forward (eval mode), optionally with the
    same bf16 matmul-operand rounding as the kernel."""
    xc = x.astype(matmul_dtype)
    h = jnp.einsum("bsd,fd->bsf", xc, w1.astype(matmul_dtype),
                   preferred_element_type=jnp.float32) + b1
    g = 0.5 * h * (1.0 + lax.erf(h * jnp.float32(_SQRT_HALF)))
    out = jnp.einsum("bsf,df->bsd", g.astype(matmul_dtype), w2.astype(matmul_dtype),
                     preferred_element_type=jnp.float32) + b2
    return out.astype(x.dtype)


if __name__ == "__main__":
    key = jax.random.PRNGKey(0)
    k_x, k_w1, k_b1, k_w2, k_b2, k_x2 = jax.random.split(key, 6)

    D, F = EMBEDDING_DIM, FEEDFORWARD_DIM

    # Deterministic parameter init (uniform(-1/sqrt(fan_in), 1/sqrt(fan_in)), like nn.Linear).
    lim1 = 1.0 / jnp.sqrt(jnp.float32(D))
    lim2 = 1.0 / jnp.sqrt(jnp.float32(F))
    w1 = jax.random.uniform(k_w1, (F, D), jnp.float32, -lim1, lim1)
    b1 = jax.random.uniform(k_b1, (F,), jnp.float32, -lim1, lim1)
    w2 = jax.random.uniform(k_w2, (D, F), jnp.float32, -lim2, lim2)
    b2 = jax.random.uniform(k_b2, (D,), jnp.float32, -lim2, lim2)

    # Small shape consistent with the module (transformer FFN on (batch, seq, D)).
    batch, seq = 2, 8
    x = jax.random.normal(k_x, (batch, seq, D), jnp.float32)

    out = jax.block_until_ready(feedforward_pallas(x, w1, b1, w2, b2))
    assert out.shape == (batch, seq, D)

    ref_matched = feedforward_ref(x, w1, b1, w2, b2, matmul_dtype=jnp.bfloat16)
    ref_f32 = feedforward_ref(x, w1, b1, w2, b2, matmul_dtype=jnp.float32)
    assert jnp.allclose(out, ref_matched, atol=2e-3, rtol=2e-3), "mismatch vs bf16-matched reference"
    # 5e-2 tolerance vs the f32 reference is the expected bf16-operand rounding error.
    assert jnp.allclose(out, ref_f32, atol=5e-2, rtol=5e-2), "mismatch vs f32 reference"

    # Second shape exercises the large-tile path: M=2000 -> tm=1024, cdiv grid of 2 with padding.
    batch2, seq2 = 4, 500
    x2 = jax.random.normal(k_x2, (batch2, seq2, D), jnp.float32)
    out2 = jax.block_until_ready(feedforward_pallas(x2, w1, b1, w2, b2))
    ref2 = feedforward_ref(x2, w1, b1, w2, b2, matmul_dtype=jnp.bfloat16)
    assert out2.shape == (batch2, seq2, D)
    assert jnp.allclose(out2, ref2, atol=2e-3, rtol=2e-3), "mismatch vs reference (large-tile path)"

    print("KERNEL_OK")
</pallas_src>

<mosaic_0001>
module attributes {stable_mosaic.version = 11 : i64} {
  func.func @_ffn_kernel(%arg0: i32, %arg1: memref<256x128xbf16, #tpu.memory_space<vmem>>, %arg2: memref<128x512xbf16, #tpu.memory_space<vmem>>, %arg3: memref<1x512xf32, #tpu.memory_space<vmem>>, %arg4: memref<512x128xbf16, #tpu.memory_space<vmem>>, %arg5: memref<1x128xf32, #tpu.memory_space<vmem>>, %arg6: memref<256x128xf32, #tpu.memory_space<vmem>>) attributes {dimension_semantics = [#tpu.dimension_semantics<parallel>], iteration_bounds = array<i64: 1>, scalar_prefetch = 0 : i64, scratch_operands = 0 : i64, tpu.core_type = #tpu.core_type<tc>, window_params = [{transform_indices = @transform_0, window_bounds = array<i64: 256, 128>}, {pipeline_mode = #tpu.pipeline_mode<synchronous>, transform_indices = @transform_1, window_bounds = array<i64: 128, 512>}, {pipeline_mode = #tpu.pipeline_mode<synchronous>, transform_indices = @transform_2, window_bounds = array<i64: 1, 512>}, {pipeline_mode = #tpu.pipeline_mode<synchronous>, transform_indices = @transform_3, window_bounds = array<i64: 512, 128>}, {pipeline_mode = #tpu.pipeline_mode<synchronous>, transform_indices = @transform_4, window_bounds = array<i64: 1, 128>}, {transform_indices = @transform_5, window_bounds = array<i64: 256, 128>}]} {
    %c0 = arith.constant 0 : index
    %c0_0 = arith.constant 0 : index
    %0 = vector.load %arg1[%c0, %c0_0] : memref<256x128xbf16, #tpu.memory_space<vmem>>, vector<256x128xbf16>
    %c0_1 = arith.constant 0 : index
    %c0_2 = arith.constant 0 : index
    %1 = vector.load %arg2[%c0_1, %c0_2] : memref<128x512xbf16, #tpu.memory_space<vmem>>, vector<128x512xbf16>
    %cst = arith.constant dense<0.000000e+00> : vector<256x512xf32>
    %2 = tpu.matmul %0, %1, %cst {dimension_numbers = #tpu.dot_dimension_numbers<[1], [0], [0], [1], [0, 0, 1, 1], [], []>} : vector<256x128xbf16>, vector<128x512xbf16>, vector<256x512xf32> -> vector<256x512xf32>
    %c0_3 = arith.constant 0 : index
    %c0_4 = arith.constant 0 : index
    %3 = vector.load %arg3[%c0_3, %c0_4] : memref<1x512xf32, #tpu.memory_space<vmem>>, vector<1x512xf32>
    %4 = vector.broadcast %3 : vector<1x512xf32> to vector<256x512xf32>
    %5 = arith.addf %2, %4 : vector<256x512xf32>
    %cst_5 = arith.constant 5.000000e-01 : f32
    %6 = vector.broadcast %cst_5 : f32 to vector<256x512xf32>
    %7 = arith.mulf %6, %5 : vector<256x512xf32>
    %cst_6 = arith.constant 0.707106769 : f32
    %8 = vector.broadcast %cst_6 : f32 to vector<256x512xf32>
    %9 = arith.mulf %5, %8 : vector<256x512xf32>
    %10 = math.erf %9 : vector<256x512xf32>
    %cst_7 = arith.constant 1.000000e+00 : f32
    %11 = vector.broadcast %cst_7 : f32 to vector<256x512xf32>
    %12 = arith.addf %11, %10 : vector<256x512xf32>
    %13 = arith.mulf %7, %12 : vector<256x512xf32>
    %14 = arith.truncf %13 : vector<256x512xf32> to vector<256x512xbf16>
    %c0_8 = arith.constant 0 : index
    %c0_9 = arith.constant 0 : index
    %15 = vector.load %arg4[%c0_8, %c0_9] : memref<512x128xbf16, #tpu.memory_space<vmem>>, vector<512x128xbf16>
    %cst_10 = arith.constant dense<0.000000e+00> : vector<256x128xf32>
    %16 = tpu.matmul %14, %15, %cst_10 {dimension_numbers = #tpu.dot_dimension_numbers<[1], [0], [0], [1], [0, 0, 1, 1], [], []>} : vector<256x512xbf16>, vector<512x128xbf16>, vector<256x128xf32> -> vector<256x128xf32>
    %c0_11 = arith.constant 0 : index
    %c0_12 = arith.constant 0 : index
    %17 = vector.load %arg5[%c0_11, %c0_12] : memref<1x128xf32, #tpu.memory_space<vmem>>, vector<1x128xf32>
    %18 = vector.broadcast %17 : vector<1x128xf32> to vector<256x128xf32>
    %19 = arith.addf %16, %18 : vector<256x128xf32>
    %c0_13 = arith.constant 0 : index
    %c0_14 = arith.constant 0 : index
    %20 = vector.load %arg6[%c0_13, %c0_14] : memref<256x128xf32, #tpu.memory_space<vmem>>, vector<256x128xf32>
    tpu.vector_store %arg6[%c0_13, %c0_14], %19 {strides = array<i32>} : memref<256x128xf32, #tpu.memory_space<vmem>>, vector<256x128xf32>,
    return
  }
  func.func @transform_0(%arg0: i32) -> (i32, i32) {
    %c0_i32 = arith.constant 0 : i32
    %c0_i32_0 = arith.constant 0 : i32
    return %arg0, %c0_i32 : i32, i32
  }
  func.func @transform_1(%arg0: i32) -> (i32, i32) {
    %c0_i32 = arith.constant 0 : i32
    %c0_i32_0 = arith.constant 0 : i32
    %c0_i32_1 = arith.constant 0 : i32
    return %c0_i32, %c0_i32_0 : i32, i32
  }
  func.func @transform_2(%arg0: i32) -> (i32, i32) {
    %c0_i32 = arith.constant 0 : i32
    %c0_i32_0 = arith.constant 0 : i32
    %c0_i32_1 = arith.constant 0 : i32
    return %c0_i32, %c0_i32_0 : i32, i32
  }
  func.func @transform_3(%arg0: i32) -> (i32, i32) {
    %c0_i32 = arith.constant 0 : i32
    %c0_i32_0 = arith.constant 0 : i32
    %c0_i32_1 = arith.constant 0 : i32
    return %c0_i32, %c0_i32_0 : i32, i32
  }
  func.func @transform_4(%arg0: i32) -> (i32, i32) {
    %c0_i32 = arith.constant 0 : i32
    %c0_i32_0 = arith.constant 0 : i32
    %c0_i32_1 = arith.constant 0 : i32
    return %c0_i32, %c0_i32_0 : i32, i32
  }
  func.func @transform_5(%arg0: i32) -> (i32, i32) {
    %c0_i32 = arith.constant 0 : i32
    %c0_i32_0 = arith.constant 0 : i32
    return %arg0, %c0_i32 : i32, i32
  }
}

</mosaic_0001>

<bundles_post_ra>
// kernel: tpu_custom_call.1
= control target key start
LH: loop header
LB: loop body
LE: loop exit
PB: predicated region body
PF: predicated region fallthrough
CT: control target
= control target key end

     0   :  { %10 = vsyncpa [#allocation3], 0  ;;  %s4171_s0 = inlined_call_operand.hbm [shape: bf16[256,128], index: 0, kind: input, shape index: {}]   ;;  %s4172_s1 = inlined_call_operand.hbm [shape: bf16[128,512], index: 1, kind: input, shape index: {}]   ;;  %s4173_s2 = inlined_call_operand.vmem [shape: f32[1,512], index: 2, kind: input, shape index: {}]   ;;  %s4174_s3 = inlined_call_operand.hbm [shape: bf16[512,128], index: 3, kind: input, shape index: {}]   ;;  %s4175_s4 = inlined_call_operand.vmem [shape: f32[1,128], index: 4, kind: input, shape index: {}]   ;;  %s4176_s5 = inlined_call_operand.hbm [shape: f32[256,128], index: 5, kind: output, shape index: {}]  }
   0x1   :  { %11 = vsyncpa [#allocation6], 0 }
   0x2   :  { %12 = vsyncpa [#allocation4], 0  ;;  %s2892_s18 = smov [#allocation5]   ;;  %s2798_s22 = scalar_lea.hbm %s4172_s1, 4096 }
   0x3   :  { %s30_s19 = sshll.u32 %s2892_s18, 4  ;;  %p2799_p0 = scmp.ne.s32.totalorder %s4172_s1, %s2798_s22  ;;  %s31_s19 = int_to_ptr.vmem [resolvable:$true] %s30_s19 }
   0x4   :  { %p2802_p1 = scmp.lt.u32.totalorder %s2798_s22, %s4172_s1 }
   0x6   :  { %p2804_p2 = pnand %p2802_p1, %p2799_p0 }
   0x8   :  { %2807 = shalt.err (!%p2804_p2)
}
   0x9   :  { %s2808_s27 = scalar_lea.vmem %s31_s19, 4096  ;;  %p2813_p4 = scmp.lt.s32.totalorder %s31_s19, %s31_s19 }
   0xa   :  { %p2809_p3 = scmp.ne.s32.totalorder %s31_s19, %s2808_s27  ;;  %p2814_p5 = scmp.lt.s32.totalorder %s2808_s27, %s2808_s27 }
   0xc   :  { %p2815_p6 = por %p2814_p5, %p2813_p4 }
   0xe   :  { %p2816_p7 = pnand %p2815_p6, %p2809_p3 }
  0x10   :  { %2819 = shalt.err (!%p2816_p7)
}
  0x11   :  { %s2893_s28 = smov 256   ;;  %s2894_s29 = smov 16  }
  0x12   :  { %36 = dma.hbm_to_vmem [thread:$0]  %s4172_s1, 4096, %s31_s19, [#allocation6], %s2893_s28, %s2893_s28, %s2894_s29  }
  0x13   :  { %s2895_s7 = smov [#allocation2]   ;;  %s2820_s11 = scalar_lea.hbm %s4171_s0, 2048 }
  0x14   :  { %s18_s8 = sshll.u32 %s2895_s7, 4  ;;  %p2821_p8 = scmp.ne.s32.totalorder %s4171_s0, %s2820_s11  ;;  %s19_s8 = int_to_ptr.vmem [resolvable:$true] %s18_s8 }
  0x15   :  { %p2824_p9 = scmp.lt.u32.totalorder %s2820_s11, %s4171_s0 }
  0x17   :  { %p2826_p10 = pnand %p2824_p9, %p2821_p8 }
  0x19   :  { %2829 = shalt.err (!%p2826_p10)
}
  0x1a   :  { %s2830_s16 = scalar_lea.vmem %s19_s8, 2048  ;;  %p2835_p12 = scmp.lt.s32.totalorder %s19_s8, %s19_s8 }
  0x1b   :  { %p2831_p11 = scmp.ne.s32.totalorder %s19_s8, %s2830_s16  ;;  %p2836_p13 = scmp.lt.s32.totalorder %s2830_s16, %s2830_s16 }
  0x1d   :  { %p2837_p0 = por %p2836_p13, %p2835_p12 }
  0x1f   :  { %p2838_p1 = pnand %p2837_p0, %p2831_p11 }
  0x21   :  { %2841 = shalt.err (!%p2838_p1)
}
  0x22   :  { %s2896_s1 = smov 64   ;;  %s2897_s17 = smov 4  }
  0x23   :  { %24 = dma.hbm_to_vmem [thread:$0]  %s4171_s0, 2048, %s19_s8, [#allocation3], %s2896_s1, %s2896_s1, %s2897_s17  }
  0x24   :  { %s2898_s20 = smov [#allocation7]   ;;  %s2842_s24 = scalar_lea.hbm %s4174_s3, 4096 }
  0x25   :  { %s44_s21 = sshll.u32 %s2898_s20, 4  ;;  %p2843_p2 = scmp.ne.s32.totalorder %s4174_s3, %s2842_s24  ;;  %s45_s21 = int_to_ptr.vmem [resolvable:$true] %s44_s21 }
  0x26   :  { %p2846_p3 = scmp.lt.u32.totalorder %s2842_s24, %s4174_s3 }
  0x28   :  { %p2848_p4 = pnand %p2846_p3, %p2843_p2 }
  0x2a   :  { %2851 = shalt.err (!%p2848_p4)
}
  0x2b   :  { %s2852_s29 = scalar_lea.vmem %s45_s21, 4096  ;;  %p2857_p6 = scmp.lt.s32.totalorder %s45_s21, %s45_s21 }
  0x2c   :  { %p2853_p5 = scmp.ne.s32.totalorder %s45_s21, %s2852_s29  ;;  %p2858_p7 = scmp.lt.s32.totalorder %s2852_s29, %s2852_s29 }
  0x2e   :  { %p2859_p8 = por %p2858_p7, %p2857_p6 }
  0x30   :  { %p2860_p9 = pnand %p2859_p8, %p2853_p5 }
  0x32   :  { %2863 = shalt.err (!%p2860_p9)
}
  0x33   :  { %50 = dma.hbm_to_vmem [thread:$0]  %s4174_s3, 4096, %s45_s21, [#allocation6], %s2896_s1, %s2896_s1, %s2897_s17  }
  0x34   :  { %2886 = dma.done.wait [#allocation3], 2048  }
  0x35   :  { %2887 = vsyncadd [#allocation3], 4294965248 }
  0x36   :  { %2888 = dma.done.wait [#allocation6], 8192  }
  0x37   :  { %2889 = vsyncadd [#allocation6], 4294959104  ;;  %v2899_v0 = vmov 0   ;;  %v2446_v1 = vld [vmem:[#allocation5 + $0x4] ss:$16 sps:$4 sm:$0xff]   ;;  %v2495_v35 = vld [vmem:[#allocation2 + $0x8] sm:$0xff]  }
  0x38   :  { %437 = vmatprep.mubr.bf16.mxu0 %v2899_v0  ;;  %630 = vmatprep.mubr.bf16.mxu1 %v2899_v0  ;;  %v2448_v2 = vld [vmem:[#allocation5 + $0xc] ss:$16 sps:$4 sm:$0xff]   ;;  %v2450_v3 = vld [vmem:[#allocation5] ss:$16 sps:$4 sm:$0xff]   ;;  %v2451_v4 = vld [vmem:[#allocation5 + $0x8] ss:$16 sps:$4 sm:$0xff]  }
  0x39   :  { %405 = vmatprep.subr.bf16.mxu0 %v2446_v1  ;;  %598 = vmatprep.subr.bf16.mxu1 %v2448_v2  ;;  %v2452_v5 = vld [vmem:[#allocation5 + $0x24] ss:$16 sps:$4 sm:$0xff]   ;;  %v2454_v6 = vld [vmem:[#allocation5 + $0x2c] ss:$16 sps:$4 sm:$0xff]   ;;  %v2456_v7 = vld [vmem:[#allocation5 + $0x20] ss:$16 sps:$4 sm:$0xff]  }
  0x3a   :  { %406 = vmatpush1.bf16.msra.mxu0 %v2450_v3  ;;  %599 = vmatpush1.bf16.msra.mxu1 %v2451_v4  ;;  %v2457_v8 = vld [vmem:[#allocation5 + $0x28] ss:$16 sps:$4 sm:$0xff]   ;;  %v2458_v9 = vld [vmem:[#allocation5 + $0x44] ss:$16 sps:$4 sm:$0xff]   ;;  %v2460_v10 = vld [vmem:[#allocation5 + $0x4c] ss:$16 sps:$4 sm:$0xff]  }
  0x3b   :  { %407 = vmatprep.subr.bf16.mxu0 %v2452_v5  ;;  %600 = vmatprep.subr.bf16.mxu1 %v2454_v6  ;;  %v2462_v11 = vld [vmem:[#allocation5 + $0x40] ss:$16 sps:$4 sm:$0xff]   ;;  %v2463_v12 = vld [vmem:[#allocation5 + $0x48] ss:$16 sps:$4 sm:$0xff]   ;;  %v2464_v13 = vld [vmem:[#allocation5 + $0x64] ss:$16 sps:$4 sm:$0xff]  }
  0x3c   :  { %v2466_v14 = vld [vmem:[#allocation5 + $0x6c] ss:$16 sps:$4 sm:$0xff]   ;;  %v2468_v15 = vld [vmem:[#allocation5 + $0x60] ss:$16 sps:$4 sm:$0xff]   ;;  %v2469_v16 = vld [vmem:[#allocation5 + $0x68] ss:$16 sps:$4 sm:$0xff]  }
  0x3d   :  { %v2470_v17 = vld [vmem:[#allocation5 + $0x84] ss:$16 sps:$4 sm:$0xff]   ;;  %v2472_v18 = vld [vmem:[#allocation5 + $0x8c] ss:$16 sps:$4 sm:$0xff]   ;;  %v2474_v19 = vld [vmem:[#allocation5 + $0x80] ss:$16 sps:$4 sm:$0xff]  }
  0x3e   :  { %408 = vmatpush1.bf16.msra.mxu0 %v2456_v7  ;;  %601 = vmatpush1.bf16.msra.mxu1 %v2457_v8  ;;  %v2475_v20 = vld [vmem:[#allocation5 + $0x88] ss:$16 sps:$4 sm:$0xff]   ;;  %v2476_v21 = vld [vmem:[#allocation5 + $0xa4] ss:$16 sps:$4 sm:$0xff]   ;;  %v2478_v22 = vld [vmem:[#allocation5 + $0xac] ss:$16 sps:$4 sm:$0xff]  }
  0x3f   :  { %409 = vmatprep.subr.bf16.mxu0 %v2458_v9  ;;  %602 = vmatprep.subr.bf16.mxu1 %v2460_v10  ;;  %v2480_v23 = vld [vmem:[#allocation5 + $0xa0] ss:$16 sps:$4 sm:$0xff]   ;;  %v2481_v24 = vld [vmem:[#allocation5 + $0xa8] ss:$16 sps:$4 sm:$0xff]   ;;  %v2482_v25 = vld [vmem:[#allocation5 + $0xc4] ss:$16 sps:$4 sm:$0xff]  }
  0x40   :  { %v2484_v26 = vld [vmem:[#allocation5 + $0xcc] ss:$16 sps:$4 sm:$0xff]   ;;  %v2486_v27 = vld [vmem:[#allocation5 + $0xc0] ss:$16 sps:$4 sm:$0xff]   ;;  %v2487_v28 = vld [vmem:[#allocation5 + $0xc8] ss:$16 sps:$4 sm:$0xff]  }
  0x41   :  { %v2488_v29 = vld [vmem:[#allocation5 + $0xe4] ss:$16 sps:$4 sm:$0xff]   ;;  %v2490_v30 = vld [vmem:[#allocation5 + $0xec] ss:$16 sps:$4 sm:$0xff]   ;;  %v2492_v31 = vld [vmem:[#allocation5 + $0xe0] ss:$16 sps:$4 sm:$0xff]  }
  0x42   :  { %410 = vmatpush1.bf16.msra.mxu0 %v2462_v11  ;;  %603 = vmatpush1.bf16.msra.mxu1 %v2463_v12  ;;  %v2493_v32 = vld [vmem:[#allocation5 + $0xe8] ss:$16 sps:$4 sm:$0xff]   ;;  %v2494_v33 = vld [vmem:[#allocation2] sm:$0xff]   ;;  %v2496_v42 = vld [vmem:[#allocation2 + $0x10] sm:$0xff]  }
  0x43   :  { %411 = vmatprep.subr.bf16.mxu0 %v2464_v13  ;;  %604 = vmatprep.subr.bf16.mxu1 %v2466_v14  ;;  %v2508_v34 = vld [vmem:[#allocation7 + $0x40] sm:$0xff]   ;;  %v2514_v39 = vld [vmem:[#allocation7 + $0x48] sm:$0xff]   ;;  %v2518_v44 = vld [vmem:[#allocation7 + $0x50] sm:$0xff]  }
  0x44   :  { %v2509_v36 = vld [vmem:[#allocation7] sm:$0xff]   ;;  %v2515_v40 = vld [vmem:[#allocation7 + $0x8] sm:$0xff]   ;;  %v2519_v45 = vld [vmem:[#allocation7 + $0x10] sm:$0xff]  }
  0x45   :  { %v2510_v37 = vld [vmem:[#allocation7 + $0xc0] sm:$0xff]   ;;  %v2516_v41 = vld [vmem:[#allocation7 + $0xc8] sm:$0xff]   ;;  %v2520_v46 = vld [vmem:[#allocation7 + $0xd0] sm:$0xff]  }
  0x46   :  { %412 = vmatpush1.bf16.msra.mxu0 %v2468_v15  ;;  %605 = vmatpush1.bf16.msra.mxu1 %v2469_v16  ;;  %v2511_v38 = vld [vmem:[#allocation7 + $0x80] sm:$0xff]   ;;  %v2517_v43 = vld [vmem:[#allocation7 + $0x88] sm:$0xff]   ;;  %v2521_v47 = vld [vmem:[#allocation7 + $0x90] sm:$0xff]  }
  0x47   :  { %413 = vmatprep.subr.bf16.mxu0 %v2470_v17  ;;  %606 = vmatprep.subr.bf16.mxu1 %v2472_v18  ;;  %v2522_v48 = vld [vmem:[#allocation7 + $0x58] sm:$0xff]   ;;  %v2526_v53 = vld [vmem:[#allocation7 + $0x60] sm:$0xff]   ;;  %v2530_v57 = vld [vmem:[#allocation7 + $0x68] sm:$0xff]   ;;  %v129_v18 = vlaneseq }
  0x48   :  { %v2523_v49 = vld [vmem:[#allocation7 + $0x18] sm:$0xff]   ;;  %v2527_v54 = vld [vmem:[#allocation7 + $0x20] sm:$0xff]   ;;  %v2531_v58 = vld [vmem:[#allocation7 + $0x28] sm:$0xff]  }
  0x49   :  { %v2524_v50 = vld [vmem:[#allocation7 + $0xd8] sm:$0xff]   ;;  %v2528_v55 = vld [vmem:[#allocation7 + $0xe0] sm:$0xff]   ;;  %v2532_v59 = vld [vmem:[#allocation7 + $0xe8] sm:$0xff]  }
  0x4a   :  { %414 = vmatpush1.bf16.msra.mxu0 %v2474_v19  ;;  %607 = vmatpush1.bf16.msra.mxu1 %v2475_v20  ;;  %v2497_v51 = vld [vmem:[#allocation2 + $0x18] sm:$0xff]   ;;  %v2529_v56 = vld [vmem:[#allocation7 + $0xa0] sm:$0xff]   ;;  %v2533_v61 = vld [vmem:[#allocation7 + $0xa8] sm:$0xff]   ;;  %v130_v19 = vshrl.u32 %v129_v18, 7 }
  0x4b   :  { %415 = vmatprep.subr.bf16.mxu0 %v2476_v21  ;;  %608 = vmatprep.subr.bf16.mxu1 %v2478_v22  ;;  %v2525_v52 = vld [vmem:[#allocation7 + $0x98] sm:$0xff]   ;;  %v2498_v60 = vld [vmem:[#allocation2 + $0x20] sm:$0xff]   ;;  %v2534_v62 = vld [vmem:[#allocation7 + $0x70] sm:$0xff]  }
  0x4c   :  { %v2535_v63 = vld [vmem:[#allocation7 + $0x30] sm:$0xff]   ;;  %v2499_v3 = vld [vmem:[#allocation2 + $0x28] sm:$0xff]   ;;  %v2501_v5 = vld [vmem:[#allocation2 + $0x38] sm:$0xff]   ;;  %v131_v20 = vsub.s32 0, %v130_v19  ;;  %v139_v21 = vsub.s32 2, %v130_v19 }
  0x4d   :  { %v2536_v1 = vld [vmem:[#allocation7 + $0xf0] sm:$0xff]   ;;  %v2502_v6 = vld [vmem:[#allocation2 + $0x40] sm:$0xff]   ;;  %v2503_v7 = vld [vmem:[#allocation2 + $0x48] sm:$0xff]  }
  0x4e   :  { %416 = vmatpush1.bf16.msra.mxu0 %v2480_v23  ;;  %609 = vmatpush1.bf16.msra.mxu1 %v2481_v24  ;;  %v2537_v2 = vld [vmem:[#allocation7 + $0xb0] sm:$0xff]   ;;  %v2505_v9 = vld [vmem:[#allocation2 + $0x58] sm:$0xff]   ;;  %v2506_v10 = vld [vmem:[#allocation2 + $0x60] sm:$0xff]   ;;  %v135_v23 = vsub.s32 1, %v130_v19  ;;  %v143_v24 = vsub.s32 3, %v130_v19 }
  0x4f   :  { %417 = vmatprep.subr.bf16.mxu0 %v2482_v25  ;;  %610 = vmatprep.subr.bf16.mxu1 %v2484_v26  ;;  %v2500_v4 = vld [vmem:[#allocation2 + $0x30] sm:$0xff]   ;;  %v2507_v11 = vld [vmem:[#allocation2 + $0x68] sm:$0xff]   ;;  %v2538_v12 = vld [vmem:[#allocation7 + $0x78] sm:$0xff]  }
  0x50   :  { %v2504_v8 = vld [vmem:[#allocation2 + $0x50] sm:$0xff]   ;;  %v2539_v14 = vld [vmem:[#allocation7 + $0x38] sm:$0xff]   ;;  %v127_v22 = vld [vmem:[%s4173_s2] sm:$0xf] }
  0x51   :  { %v2512_v13 = vld [vmem:[#allocation2 + $0x70] sm:$0xff]   ;;  %v2540_v15 = vld [vmem:[#allocation7 + $0xf8] sm:$0xff]   ;;  %v3004_v25 = vrot.slane %v127_v22, %v131_v20  ;;  %v3006_v26 = vrot.slane %v127_v22, %v139_v21 }
  0x52   :  { %418 = vmatpush1.bf16.msra.mxu0 %v2486_v27  ;;  %611 = vmatpush1.bf16.msra.mxu1 %v2487_v28  ;;  %v2541_v16 = vld [vmem:[#allocation7 + $0xb8] sm:$0xff]   ;;  %v3008_v27 = vrot.slane %v127_v22, %v135_v23 }
  0x53   :  { %419 = vmatprep.subr.bf16.mxu0 %v2488_v29  ;;  %612 = vmatprep.subr.bf16.mxu1 %v2490_v30  ;;  %v2513_v17 = vld [vmem:[#allocation2 + $0x78] sm:$0xff]  }
  0x56   :  { %420 = vmatpush1.bf16.msra.mxu0 %v2492_v31  ;;  %613 = vmatpush1.bf16.msra.mxu1 %v2493_v32 }
  0x57   :  { %2211 = vmatprep.subr.bf16.mxu0 %v2508_v34  ;;  %2323 = vmatprep.subr.bf16.mxu1 %v2510_v37 }
  0x59   :  { %438 = vmatmul.mubr.bf16.vlgmr.msra.gmra.mrb[0].mxu0 %v2494_v33  ;;  %631 = vmatmul.mubr.bf16.vlgmr.msra.gmra.mrb[0].mxu1 %v2494_v33 }
  0x5a   :  { %447 = vmatprep.mubr.bf16.mxu0 %v2899_v0  ;;  %640 = vmatprep.mubr.bf16.mxu1 %v2899_v0 }
  0x5b   :  { %2212 = vmatpush3.bf16.msra.mxu0 %v2509_v36  ;;  %2324 = vmatpush3.bf16.msra.mxu1 %v2511_v38 }
  0x5c   :  { %2213 = vmatprep.subr.bf16.mxu0 %v2514_v39  ;;  %2325 = vmatprep.subr.bf16.mxu1 %v2516_v41 }
  0x5f   :  { %2214 = vmatpush3.bf16.msra.mxu0 %v2515_v40  ;;  %2326 = vmatpush3.bf16.msra.mxu1 %v2517_v43 }
  0x60   :  { %2215 = vmatprep.subr.bf16.mxu0 %v2518_v44  ;;  %2327 = vmatprep.subr.bf16.mxu1 %v2520_v46 }
  0x61   :  { %448 = vmatmul.mubr.bf16.gmra.mrb[4].mxu0 %v2495_v35  ;;  %641 = vmatmul.mubr.bf16.gmra.mrb[4].mxu1 %v2495_v35 }
  0x62   :  { %457 = vmatprep.mubr.bf16.mxu0 %v2899_v0  ;;  %650 = vmatprep.mubr.bf16.mxu1 %v2899_v0 }
  0x63   :  { %2216 = vmatpush3.bf16.msra.mxu0 %v2519_v45  ;;  %2328 = vmatpush3.bf16.msra.mxu1 %v2521_v47 }
  0x64   :  { %2217 = vmatprep.subr.bf16.mxu0 %v2522_v48  ;;  %2329 = vmatprep.subr.bf16.mxu1 %v2524_v50 }
  0x67   :  { %2218 = vmatpush3.bf16.msra.mxu0 %v2523_v49  ;;  %2330 = vmatpush3.bf16.msra.mxu1 %v2525_v52 }
  0x68   :  { %2219 = vmatprep.subr.bf16.mxu0 %v2526_v53  ;;  %2331 = vmatprep.subr.bf16.mxu1 %v2528_v55 }
  0x69   :  { %458 = vmatmul.mubr.bf16.gmra.mrb[8].mxu0 %v2496_v42  ;;  %651 = vmatmul.mubr.bf16.gmra.mrb[8].mxu1 %v2496_v42 }
  0x6a   :  { %467 = vmatprep.mubr.bf16.mxu0 %v2899_v0  ;;  %660 = vmatprep.mubr.bf16.mxu1 %v2899_v0 }
  0x6b   :  { %2220 = vmatpush3.bf16.msra.mxu0 %v2527_v54  ;;  %2332 = vmatpush3.bf16.msra.mxu1 %v2529_v56 }
  0x6c   :  { %2221 = vmatprep.subr.bf16.mxu0 %v2530_v57  ;;  %2333 = vmatprep.subr.bf16.mxu1 %v2532_v59 }
  0x6f   :  { %2222 = vmatpush3.bf16.msra.mxu0 %v2531_v58  ;;  %2334 = vmatpush3.bf16.msra.mxu1 %v2533_v61 }
  0x70   :  { %2223 = vmatprep.subr.bf16.mxu0 %v2534_v62  ;;  %2335 = vmatprep.subr.bf16.mxu1 %v2536_v1 }
  0x71   :  { %468 = vmatmul.mubr.bf16.gmra.mrb[12].mxu0 %v2497_v51  ;;  %661 = vmatmul.mubr.bf16.gmra.mrb[12].mxu1 %v2497_v51 }
  0x72   :  { %477 = vmatprep.mubr.bf16.mxu0 %v2899_v0  ;;  %670 = vmatprep.mubr.bf16.mxu1 %v2899_v0 }
  0x73   :  { %2224 = vmatpush3.bf16.msra.mxu0 %v2535_v63  ;;  %2336 = vmatpush3.bf16.msra.mxu1 %v2537_v2 }
  0x74   :  { %2225 = vmatprep.subr.bf16.mxu0 %v2538_v12  ;;  %2337 = vmatprep.subr.bf16.mxu1 %v2540_v15 }
  0x77   :  { %2226 = vmatpush3.bf16.msra.mxu0 %v2539_v14  ;;  %2338 = vmatpush3.bf16.msra.mxu1 %v2541_v16 }
  0x79   :  { %478 = vmatmul.mubr.bf16.gmra.mrb[16].mxu0 %v2498_v60  ;;  %671 = vmatmul.mubr.bf16.gmra.mrb[16].mxu1 %v2498_v60 }
  0x7a   :  { %487 = vmatprep.mubr.bf16.mxu0 %v2899_v0  ;;  %680 = vmatprep.mubr.bf16.mxu1 %v2899_v0 }
  0x81   :  { %488 = vmatmul.mubr.bf16.gmra.mrb[20].mxu0 %v2499_v3  ;;  %681 = vmatmul.mubr.bf16.gmra.mrb[20].mxu1 %v2499_v3 }
  0x82   :  { %497 = vmatprep.mubr.bf16.mxu0 %v2899_v0  ;;  %690 = vmatprep.mubr.bf16.mxu1 %v2899_v0 }
  0x89   :  { %498 = vmatmul.mubr.bf16.gmra.mrb[24].mxu0 %v2500_v4  ;;  %691 = vmatmul.mubr.bf16.gmra.mrb[24].mxu1 %v2500_v4 }
  0x8a   :  { %507 = vmatprep.mubr.bf16.mxu0 %v2899_v0  ;;  %700 = vmatprep.mubr.bf16.mxu1 %v2899_v0 }
  0x91   :  { %508 = vmatmul.mubr.bf16.gmra.mrb[28].mxu0 %v2501_v5  ;;  %701 = vmatmul.mubr.bf16.gmra.mrb[28].mxu1 %v2501_v5 }
  0x92   :  { %517 = vmatprep.mubr.bf16.mxu0 %v2899_v0  ;;  %710 = vmatprep.mubr.bf16.mxu1 %v2899_v0 }
  0x99   :  { %518 = vmatmul.mubr.bf16.gmra.mrb[32].mxu0 %v2502_v6  ;;  %711 = vmatmul.mubr.bf16.gmra.mrb[32].mxu1 %v2502_v6 }
  0x9a   :  { %527 = vmatprep.mubr.bf16.mxu0 %v2899_v0  ;;  %720 = vmatprep.mubr.bf16.mxu1 %v2899_v0 }
  0xa1   :  { %528 = vmatmul.mubr.bf16.gmra.mrb[36].mxu0 %v2503_v7  ;;  %721 = vmatmul.mubr.bf16.gmra.mrb[36].mxu1 %v2503_v7 }
  0xa2   :  { %537 = vmatprep.mubr.bf16.mxu0 %v2899_v0  ;;  %730 = vmatprep.mubr.bf16.mxu1 %v2899_v0 }
  0xa9   :  { %538 = vmatmul.mubr.bf16.gmra.mrb[40].mxu0 %v2504_v8  ;;  %731 = vmatmul.mubr.bf16.gmra.mrb[40].mxu1 %v2504_v8 }
  0xaa   :  { %547 = vmatprep.mubr.bf16.mxu0 %v2899_v0  ;;  %740 = vmatprep.mubr.bf16.mxu1 %v2899_v0 }
  0xb1   :  { %548 = vmatmul.mubr.bf16.gmra.mrb[44].mxu0 %v2505_v9  ;;  %741 = vmatmul.mubr.bf16.gmra.mrb[44].mxu1 %v2505_v9 }
  0xb2   :  { %557 = vmatprep.mubr.bf16.mxu0 %v2899_v0  ;;  %750 = vmatprep.mubr.bf16.mxu1 %v2899_v0 }
  0xb9   :  { %558 = vmatmul.mubr.bf16.gmra.mrb[48].mxu0 %v2506_v10  ;;  %751 = vmatmul.mubr.bf16.gmra.mrb[48].mxu1 %v2506_v10 }
  0xba   :  { %567 = vmatprep.mubr.bf16.mxu0 %v2899_v0  ;;  %760 = vmatprep.mubr.bf16.mxu1 %v2899_v0 }
  0xc1   :  { %568 = vmatmul.mubr.bf16.gmra.mrb[52].mxu0 %v2507_v11  ;;  %761 = vmatmul.mubr.bf16.gmra.mrb[52].mxu1 %v2507_v11 }
  0xc2   :  { %577 = vmatprep.mubr.bf16.mxu0 %v2899_v0  ;;  %770 = vmatprep.mubr.bf16.mxu1 %v2899_v0 }
  0xc9   :  { %578 = vmatmul.mubr.bf16.gmra.mrb[56].mxu0 %v2512_v13  ;;  %771 = vmatmul.mubr.bf16.gmra.mrb[56].mxu1 %v2512_v13 }
  0xca   :  { %587 = vmatprep.mubr.bf16.mxu0 %v2899_v0  ;;  %780 = vmatprep.mubr.bf16.mxu1 %v2899_v0  ;;  %v3010_v0 = vrot.slane %v127_v22, %v143_v24 }
  0xd1   :  { %588 = vmatmul.mubr.bf16.gmra.mrb[60].mxu0 %v2513_v17  ;;  %781 = vmatmul.mubr.bf16.gmra.mrb[60].mxu1 %v2513_v17 }
 0x12c   :  { %v439_v28 = vpop.f32.mrb[0].mxu0  ;;  %v632_v29 = vpop.f32.mrb[0].mxu1 }
 0x12d   :  { %v440_v30 = vadd.f32 %v439_v28, %v3004_v25  ;;  %v633_v31 = vadd.f32 %v632_v29, %v3006_v26  ;;  %v441_v32 = vpop.f32.mrb[1].mxu0  ;;  %v634_v33 = vpop.f32.mrb[1].mxu1 }
 0x12e   :  { %v442_v34 = vadd.f32 %v441_v32, %v3008_v27  ;;  %v635_v35 = vadd.f32 %v634_v33, %v3010_v0  ;;  %v443_v36 = vpop.f32.mrb[2].mxu0  ;;  %v636_v37 = vpop.f32.mrb[2].mxu1 }
 0x12f   :  { %v919_v38 = vmul.f32 0.70710677, %v440_v30  ;;  %v921_v39 = vmul.f32 0.70710677, %v633_v31  ;;  %v444_v42 = vadd.f32 %v443_v36, %v3004_v25  ;;  %v637_v43 = vadd.f32 %v636_v37, %v3006_v26  ;;  %v445_v44 = vpop.f32.mrb[3].mxu0  ;;  %v638_v45 = vpop.f32.mrb[3].mxu1 }
 0x130   :  { %v920_v40 = vmul.f32 0.70710677, %v442_v34  ;;  %v922_v41 = vmul.f32 0.70710677, %v635_v35  ;;  %v446_v46 = vadd.f32 %v445_v44, %v3008_v27  ;;  %v639_v47 = vadd.f32 %v638_v45, %v3010_v0 }
 0x131   :  { %2542 = verf.f32 %v919_v38  ;;  %v923_v48 = vmul.f32 0.70710677, %v444_v42  ;;  %v925_v49 = vmul.f32 0.70710677, %v637_v43  ;;  %v791_v3 = vmul.f32 0.5, %v440_v30 }
 0x132   :  { %2544 = verf.f32 %v921_v39  ;;  %v924_v50 = vmul.f32 0.70710677, %v446_v46  ;;  %v926_v52 = vmul.f32 0.70710677, %v639_v47  ;;  %v793_v10 = vmul.f32 0.5, %v633_v31 }
 0x133   :  { %2546 = verf.f32 %v920_v40  ;;  %v792_v11 = vmul.f32 0.5, %v442_v34  ;;  %v3027_v12 = vmul.f32 0.5, %v635_v35  ;;  %v795_v13 = vmul.f32 0.5, %v444_v42 }
 0x134   :  { %2548 = verf.f32 %v922_v41  ;;  %v449_v51 = vpop.f32.mrb[4].mxu0  ;;  %v642_v54 = vpop.f32.mrb[4].mxu1  ;;  %v797_v16 = vmul.f32 0.5, %v637_v43  ;;  %v3029_v21 = vmul.f32 0.5, %v446_v46  ;;  %v3031_v22 = vmul.f32 0.5, %v639_v47 }
 0x135   :  { %2550 = verf.f32 %v923_v48  ;;  %v450_v53 = vadd.f32 %v449_v51, %v3004_v25  ;;  %v451_v55 = vpop.f32.mrb[5].mxu0  ;;  %v643_v56 = vadd.f32 %v642_v54, %v3006_v26  ;;  %v644_v58 = vpop.f32.mrb[5].mxu1 }
 0x136   :  { %2552 = verf.f32 %v925_v49  ;;  %v452_v57 = vadd.f32 %v451_v55, %v3008_v27  ;;  %v453_v59 = vpop.f32.mrb[6].mxu0  ;;  %v645_v61 = vadd.f32 %v644_v58, %v3010_v0  ;;  %v646_v62 = vpop.f32.mrb[6].mxu1 }
 0x137   :  { %2554 = verf.f32 %v924_v50  ;;  %v927_v60 = vmul.f32 0.70710677, %v450_v53  ;;  %v455_v63 = vpop.f32.mrb[7].mxu0  ;;  %v929_v1 = vmul.f32 0.70710677, %v643_v56  ;;  %v648_v2 = vpop.f32.mrb[7].mxu1  ;;  %v454_v6 = vadd.f32 %v453_v59, %v3004_v25 }
 0x138   :  { %2556 = verf.f32 %v926_v52  ;;  %v928_v4 = vmul.f32 0.70710677, %v452_v57  ;;  %v930_v5 = vmul.f32 0.70710677, %v645_v61  ;;  %v647_v7 = vadd.f32 %v646_v62, %v3006_v26 }
 0x139   :  { %2558 = verf.f32 %v927_v60  ;;  %v456_v8 = vadd.f32 %v455_v63, %v3008_v27  ;;  %v931_v17 = vmul.f32 0.70710677, %v454_v6  ;;  %v649_v24 = vadd.f32 %v648_v2, %v3010_v0 }
 0x13a   :  { %2560 = verf.f32 %v929_v1  ;;  %v933_v23 = vmul.f32 0.70710677, %v647_v7  ;;  %v3034_v31 = vmul.f32 0.5, %v450_v53  ;;  %v3036_v36 = vmul.f32 0.5, %v643_v56 }
 0x13b   :  { %v2543_v9 = vpop.eup %2542  ;;  %2562 = verf.f32 %v928_v4  ;;  %v932_v32 = vmul.f32 0.70710677, %v456_v8  ;;  %v3038_v37 = vmul.f32 0.5, %v452_v57  ;;  %v3040_v38 = vmul.f32 0.5, %v645_v61 }
 0x13c   :  { %v2545_v14 = vpop.eup %2544  ;;  %v1175_v15 = vadd.f32 1.0, %v2543_v9  ;;  %v459_v18 = vpop.f32.mrb[8].mxu0  ;;  %2564 = verf.f32 %v930_v5  ;;  %v3046_v45 = vmul.f32 0.5, %v454_v6  ;;  %v934_v49 = vmul.f32 0.70710677, %v649_v24 }
 0x13d   :  { %v652_v19 = vpop.f32.mrb[8].mxu1  ;;  %v2547_v20 = vpop.eup %2546  ;;  %v1177_v30 = vadd.f32 1.0, %v2545_v14  ;;  %2566 = verf.f32 %v931_v17  ;;  %v460_v50 = vadd.f32 %v459_v18, %v3004_v25  ;;  %v3061_v62 = vmul.f32 0.5, %v647_v7 }
 0x13e   :  { %v461_v28 = vpop.f32.mrb[9].mxu0  ;;  %v2549_v29 = vpop.eup %2548  ;;  %v3044_v42 = vmul.f32 %v1175_v15, %v791_v3  ;;  %v1176_v43 = vadd.f32 1.0, %v2547_v20  ;;  %2568 = verf.f32 %v933_v23  ;;  %v653_v54 = vadd.f32 %v652_v19, %v3006_v26 }
 0x13f   :  { %v654_v33 = vpop.f32.mrb[9].mxu1  ;;  %v463_v34 = vpop.f32.mrb[10].mxu0  ;;  %v3051_v52 = vmul.f32 %v1177_v30, %v793_v10  ;;  %2570 = verf.f32 %v932_v32  ;;  %v1178_v56 = vadd.f32 1.0, %v2549_v29  ;;  %v935_v58 = vmul.f32 0.70710677, %v460_v50 }
 0x140   :  { %v2551_v35 = vpop.eup %2550  ;;  %v656_v39 = vpop.f32.mrb[10].mxu1  ;;  %v462_v59 = vadd.f32 %v461_v28, %v3008_v27  ;;  %v3063_v63 = vmul.f32 0.5, %v456_v8  ;;  %v3065_v1 = vmul.f32 0.5, %v649_v24  ;;  %v3069_v4 = vmul.f32 %v1176_v43, %v792_v11 }
 0x141   :  { %v3042_v40 = vpop.f32.mrb[11].mxu0  ;;  %v2553_v41 = vpop.eup %2552  ;;  %v1179_v44 = vadd.f32 1.0, %v2551_v35  ;;  %2572 = verf.f32 %v934_v49  ;;  %v937_v14 = vmul.f32 0.70710677, %v653_v54  ;;  %v3082_v11 = vmul.f32 %v1178_v56, %v3027_v12 }
 0x142   :  { %v3048_v46 = vpop.f32.mrb[11].mxu1  ;;  %v2555_v47 = vpop.eup %2554  ;;  %v1181_v48 = vadd.f32 1.0, %v2553_v41  ;;  %2574 = verf.f32 %v935_v58  ;;  %v936_v18 = vmul.f32 0.70710677, %v462_v59  ;;  %v655_v19 = vadd.f32 %v654_v33, %v3010_v0 }
 0x143   :  { %v2557_v51 = vpop.eup %2556  ;;  %v3053_v53 = vmul.f32 %v1179_v44, %v795_v13  ;;  %v1180_v6 = vadd.f32 1.0, %v2555_v47  ;;  %v3089_v28 = vmul.f32 0.5, %v460_v50  ;;  %2576 = verf.f32 %v937_v14 }
 0x144   :  { %v2559_v55 = vpop.eup %2558  ;;  %v3056_v57 = vmul.f32 %v1181_v48, %v797_v16  ;;  %v469_v2 = vpop.f32.mrb[12].mxu0  ;;  %v1182_v13 = vadd.f32 1.0, %v2557_v51  ;;  %v464_v29 = vadd.f32 %v463_v34, %v3004_v25  ;;  %v657_v30 = vadd.f32 %v656_v39, %v3006_v26 }
 0x145   :  { %v2561_v60 = vpop.eup %2560  ;;  %v1431_v61 = vpack.c.bf16 %v3053_v53, %v3044_v42  ;;  %v3067_v3 = vpop.f32.mrb[12].mxu1  ;;  %v1183_v8 = vadd.f32 1.0, %v2559_v55  ;;  %v1308_v12 = vmul.f32 %v1180_v6, %v3029_v21  ;;  %v3094_v41 = vmul.f32 0.5, %v653_v54 }
 0x146   :  { %v1433_v5 = vpack.c.bf16 %v3056_v57, %v3051_v52  ;;  %v3073_v9 = vpop.f32.mrb[13].mxu0  ;;  %v3075_v10 = vpop.f32.mrb[13].mxu1  ;;  %v1185_v17 = vadd.f32 1.0, %v2561_v60  ;;  %2578 = verf.f32 %v936_v18  ;;  %v1310_v33 = vmul.f32 %v1182_v13, %v3031_v22 }
 0x147   :  { %v2563_v7 = vpop.eup %2562  ;;  %v3077_v15 = vpop.f32.mrb[14].mxu0  ;;  %v3098_v43 = vmul.f32 %v1183_v8, %v3034_v31  ;;  %v938_v44 = vmul.f32 0.70710677, %v655_v19  ;;  %v939_v47 = vmul.f32 0.70710677, %v464_v29  ;;  %v3103_v39 = vmul.f32 0.5, %v462_v59 }
 0x148   :  { %v3079_v16 = vpop.f32.mrb[14].mxu1  ;;  %v3085_v20 = vpop.f32.mrb[15].mxu0  ;;  %v1184_v35 = vadd.f32 1.0, %v2563_v7  ;;  %v3101_v49 = vmul.f32 %v1185_v17, %v3036_v36  ;;  %v941_v50 = vmul.f32 0.70710677, %v657_v30  ;;  %v466_v54 = vadd.f32 %v3042_v40, %v3008_v27 }
 0x149   :  { %v3087_v23 = vpop.f32.mrb[15].mxu1  ;;  %v2565_v24 = vpop.eup %2564  ;;  %2580 = verf.f32 %v938_v44  ;;  %v659_v22 = vadd.f32 %v3048_v46, %v3010_v0  ;;  %v3116_v56 = vmul.f32 0.5, %v655_v19  ;;  %v470_v58 = vadd.f32 %v469_v2, %v3004_v25 }
 0x14a   :  { %v2567_v32 = vpop.eup %2566  ;;  %v1186_v34 = vadd.f32 1.0, %v2565_v24  ;;  %v3114_v36 = vmul.f32 %v1184_v35, %v3038_v37  ;;  %2582 = verf.f32 %v939_v47  ;;  %v3123_v6 = vmul.f32 0.5, %v464_v29 }
 0x14b   :  { %v2569_v48 = vpop.eup %2568  ;;  %v1187_v51 = vadd.f32 1.0, %v2567_v32  ;;  %2584 = verf.f32 %v941_v50  ;;  %v940_v46 = vmul.f32 0.70710677, %v466_v54  ;;  %v942_v17 = vmul.f32 0.70710677, %v659_v22 }
 0x14c   :  { %v2571_v21 = vpop.eup %2570  ;;  %v3109_v31 = vpop.f32.mrb[16].mxu0  ;;  %v1189_v40 = vadd.f32 1.0, %v2569_v48  ;;  %v3130_v8 = vmul.f32 %v1186_v34, %v3040_v38  ;;  %v943_v2 = vmul.f32 0.70710677, %v470_v58  ;;  %v663_v29 = vadd.f32 %v3067_v3, %v3006_v26 }
 0x14d   :  { %v3111_v55 = vpop.f32.mrb[16].mxu1  ;;  %v3119_v59 = vpop.f32.mrb[17].mxu0  ;;  %v1188_v14 = vadd.f32 1.0, %v2571_v21  ;;  %v3135_v24 = vmul.f32 %v1187_v51, %v3046_v45  ;;  %2586 = verf.f32 %v940_v46  ;;  %v472_v32 = vadd.f32 %v3073_v9, %v3008_v27 }
 0x14e   :  { %v3121_v60 = vpop.f32.mrb[17].mxu1  ;;  %v3125_v7 = vpop.f32.mrb[18].mxu0  ;;  %2588 = verf.f32 %v942_v17  ;;  %v665_v38 = vadd.f32 %v3075_v10, %v3010_v0  ;;  %v1432_v44 = vpack.c.bf16 %v1308_v12, %v3069_v4  ;;  %v1434_v47 = vpack.c.bf16 %v1310_v33, %v3082_v11 }
 0x14f   :  { %v3127_v13 = vpop.f32.mrb[18].mxu1  ;;  %v2573_v37 = vpop.eup %2572  ;;  %v3148_v45 = vmul.f32 %v1189_v40, %v3061_v62  ;;  %v3150_v50 = vmul.f32 0.5, %v657_v30  ;;  %v945_v3 = vmul.f32 0.70710677, %v663_v29  ;;  %v3153_v9 = vmul.f32 %v1188_v14, %v3063_v63 }
 0x150   :  { %v3132_v18 = vpop.f32.mrb[19].mxu0  ;;  %v2575_v19 = vpop.eup %2574  ;;  %v1190_v34 = vadd.f32 1.0, %v2573_v37  ;;  %2590 = verf.f32 %v943_v2  ;;  %v944_v46 = vmul.f32 0.70710677, %v472_v32  ;;  %1790 = vmatprep.mubr.bf16.mxu0 %v1432_v44  ;;  %1951 = vmatprep.mubr.bf16.mxu1 %v1434_v47  ;;  %v3155_v4 = vmul.f32 0.5, %v466_v54 }
 0x151   :  { %v3141_v35 = vpop.f32.mrb[19].mxu1  ;;  %v2577_v48 = vpop.eup %2576  ;;  %v1191_v51 = vadd.f32 1.0, %v2575_v19  ;;  %v3157_v10 = vmul.f32 0.5, %v659_v22  ;;  %v946_v11 = vmul.f32 0.70710677, %v665_v38  ;;  %v474_v62 = vadd.f32 %v3077_v15, %v3004_v25  ;;  %1791 = vmatmul.mubr.bf16.vlgmr.msra.gmra.mrb[64].mxu0 %v1431_v61  ;;  %1952 = vmatmul.mubr.bf16.vlgmr.msra.gmra.mrb[64].mxu1 %v1433_v5 }
 0x152   :  { %v2579_v21 = vpop.eup %2578  ;;  %v1193_v12 = vadd.f32 1.0, %v2577_v48  ;;  %2592 = verf.f32 %v945_v3  ;;  %v667_v33 = vadd.f32 %v3079_v16, %v3006_v26  ;;  %v476_v15 = vadd.f32 %v3085_v20, %v3008_v27 }
 0x153   :  { %v2581_v53 = vpop.eup %2580  ;;  %v3180_v52 = vmul.f32 %v1190_v34, %v3065_v1  ;;  %v1192_v57 = vadd.f32 1.0, %v2579_v21  ;;  %2594 = verf.f32 %v944_v46  ;;  %v947_v61 = vmul.f32 0.70710677, %v474_v62 }
 0x154   :  { %v3167_v63 = vpop.f32.mrb[20].mxu0  ;;  %v3169_v30 = vpop.f32.mrb[20].mxu1  ;;  %v3187_v16 = vmul.f32 %v1191_v51, %v3089_v28  ;;  %v3189_v20 = vmul.f32 0.5, %v470_v58  ;;  %2596 = verf.f32 %v946_v11  ;;  %v949_v37 = vmul.f32 0.70710677, %v667_v33 }
 0x155   :  { %v3175_v54 = vpop.f32.mrb[21].mxu0  ;;  %v3177_v42 = vpop.f32.mrb[21].mxu1  ;;  %v3193_v1 = vmul.f32 0.5, %v663_v29  ;;  %v3195_v2 = vmul.f32 0.5, %v472_v32  ;;  %v948_v19 = vmul.f32 0.70710677, %v476_v15  ;;  %v669_v44 = vadd.f32 %v3087_v23, %v3010_v0 }
 0x156   :  { %v3182_v5 = vpop.f32.mrb[22].mxu0  ;;  %v3184_v22 = vpop.f32.mrb[22].mxu1  ;;  %v3202_v28 = vmul.f32 %v1193_v12, %v3094_v41  ;;  %v3204_v58 = vmul.f32 0.5, %v665_v38  ;;  %2598 = verf.f32 %v947_v61  ;;  %v480_v48 = vadd.f32 %v3109_v31, %v3004_v25 }
 0x157   :  { %v2583_v40 = vpop.eup %2582  ;;  %v3191_v14 = vpop.f32.mrb[23].mxu0  ;;  %v3209_v29 = vmul.f32 %v1192_v57, %v3103_v39  ;;  %v1194_v32 = vadd.f32 1.0, %v2581_v53  ;;  %2600 = verf.f32 %v949_v37  ;;  %v950_v3 = vmul.f32 0.70710677, %v669_v44 }
 0x158   :  { %v2585_v17 = vpop.eup %2584  ;;  %v3199_v47 = vpop.f32.mrb[23].mxu1  ;;  %v1195_v23 = vadd.f32 1.0, %v2583_v40  ;;  %2602 = verf.f32 %v948_v19  ;;  %v951_v46 = vmul.f32 0.70710677, %v480_v48  ;;  %v673_v38 = vadd.f32 %v3111_v55, %v3006_v26 }
 0x159   :  { %v2587_v34 = vpop.eup %2586  ;;  %v1197_v51 = vadd.f32 1.0, %v2585_v17  ;;  %2604 = verf.f32 %v950_v3  ;;  %v482_v31 = vadd.f32 %v3119_v59, %v3008_v27  ;;  %v3219_v57 = vmul.f32 0.5, %v474_v62 }
 0x15a   :  { %v2589_v21 = vpop.eup %2588  ;;  %v1196_v41 = vadd.f32 1.0, %v2587_v34  ;;  %2606 = verf.f32 %v951_v46  ;;  %v675_v61 = vadd.f32 %v3121_v60, %v3010_v0  ;;  %v3228_v55 = vmul.f32 %v1194_v32, %v3116_v56 }
 0x15b   :  { %v2591_v12 = vpop.eup %2590  ;;  %v1198_v53 = vadd.f32 1.0, %v2589_v21  ;;  %v3230_v59 = vmul.f32 0.5, %v667_v33  ;;  %v3232_v17 = vmul.f32 0.5, %v476_v15  ;;  %v953_v19 = vmul.f32 0.70710677, %v673_v38 }
 0x15c   :  { %v3215_v11 = vpop.f32.mrb[24].mxu0  ;;  %v3217_v39 = vpop.f32.mrb[24].mxu1  ;;  %v3239_v21 = vmul.f32 %v1195_v23, %v3123_v6  ;;  %v3242_v60 = vmul.f32 %v1197_v51, %v3150_v50  ;;  %v3244_v46 = vmul.f32 0.5, %v669_v44  ;;  %v3246_v56 = vmul.f32 0.5, %v480_v48 }
 0x15d   :  { %v3223_v40 = vpop.f32.mrb[25].mxu0  ;;  %v3225_v37 = vpop.f32.mrb[25].mxu1  ;;  %v1436_v6 = vpack.c.bf16 %v3153_v9, %v3114_v36  ;;  %v3258_v50 = vmul.f32 %v1198_v53, %v3157_v10  ;;  %v3260_v44 = vmul.f32 0.5, %v673_v38  ;;  %v954_v48 = vmul.f32 0.70710677, %v675_v61 }
 0x15e   :  { %4177 = vst [vmem:[#allocation12_spill] sm:$0xff] %v3225_v37  ;;  %v3234_v34 = vpop.f32.mrb[26].mxu0  ;;  %v3236_v62 = vpop.f32.mrb[26].mxu1  ;;  %v952_v37 = vmul.f32 0.70710677, %v482_v31  ;;  %v1438_v51 = vpack.c.bf16 %v3180_v52, %v3130_v8  ;;  %2608 = verf.f32 %v953_v19  ;;  %v1435_v10 = vpack.c.bf16 %v3135_v24, %v3098_v43 }
 0x15f   :  { %4178 = vst [vmem:[#allocation13_spill] sm:$0xff] %v3234_v34  ;;  %4179 = vst [vmem:[#allocation14_spill] sm:$0xff] %v3236_v62  ;;  %v2593_v3 = vpop.eup %2592  ;;  %v3248_v33 = vpop.f32.mrb[27].mxu0  ;;  %v3253_v34 = vmul.f32 %v1196_v41, %v3155_v4  ;;  %v1199_v62 = vadd.f32 1.0, %v2591_v12  ;;  %1798 = vmatprep.mubr.bf16.mxu0 %v1436_v6  ;;  %v484_v4 = vadd.f32 %v3125_v7, %v3004_v25  ;;  %v3268_v12 = vmul.f32 0.5, %v482_v31 }
 0x160   :  { %v3250_v15 = vpop.f32.mrb[27].mxu1  ;;  %v2595_v32 = vpop.eup %2594  ;;  %v677_v41 = vadd.f32 %v3127_v13, %v3006_v26  ;;  %1959 = vmatprep.mubr.bf16.mxu1 %v1438_v51  ;;  %v1437_v8 = vpack.c.bf16 %v3148_v45, %v3101_v49  ;;  %2610 = verf.f32 %v952_v37  ;;  %1799 = vmatmul.mubr.bf16.gmra.mrb[68].mxu0 %v1435_v10  ;;  %v486_v43 = vadd.f32 %v3132_v18, %v3008_v27 }
 0x161   :  { %4180 = vst [vmem:[#allocation15_spill] sm:$0xff] %v3250_v15  ;;  %v2597_v23 = vpop.eup %2596  ;;  %v1201_v15 = vadd.f32 1.0, %v2593_v3  ;;  %v1200_v9 = vadd.f32 1.0, %v2595_v32  ;;  %v3275_v38 = vmul.f32 %v1199_v62, %v3189_v20  ;;  %v955_v7 = vmul.f32 0.70710677, %v484_v4 }
 0x162   :  { %v2599_v36 = vpop.eup %2598  ;;  %v1202_v53 = vadd.f32 1.0, %v2597_v23  ;;  %v3279_v3 = vmul.f32 0.5, %v675_v61  ;;  %2612 = verf.f32 %v954_v48  ;;  %v957_v31 = vmul.f32 0.70710677, %v677_v41  ;;  %1960 = vmatmul.mubr.bf16.gmra.mrb[68].mxu1 %v1437_v8 }
 0x163   :  { %v2601_v52 = vpop.eup %2600  ;;  %v3288_v20 = vmul.f32 %v1201_v15, %v3193_v1  ;;  %2614 = verf.f32 %v955_v7  ;;  %v679_v61 = vadd.f32 %v3141_v35, %v3010_v0  ;;  %v490_v37 = vadd.f32 %v3167_v63, %v3004_v25 }
 0x164   :  { %v3277_v19 = vpop.f32.mrb[28].mxu0  ;;  %v2603_v13 = vpop.eup %2602  ;;  %v3299_v6 = vmul.f32 %v1200_v9, %v3195_v2  ;;  %v1203_v23 = vadd.f32 1.0, %v2599_v36  ;;  %v1205_v48 = vadd.f32 1.0, %v2601_v52  ;;  %2616 = verf.f32 %v957_v31 }
 0x165   :  { %v3283_v49 = vpop.f32.mrb[28].mxu1  ;;  %v3285_v24 = vpop.f32.mrb[29].mxu0  ;;  %v3306_v35 = vmul.f32 %v1202_v53, %v3204_v58  ;;  %v1204_v51 = vadd.f32 1.0, %v2603_v13  ;;  %v956_v63 = vmul.f32 0.70710677, %v486_v43  ;;  %v3308_v7 = vmul.f32 0.5, %v484_v4 }
 0x166   :  { %v2605_v45 = vpop.eup %2604  ;;  %v3294_v62 = vpop.f32.mrb[29].mxu1  ;;  %v958_v10 = vmul.f32 0.70710677, %v679_v61  ;;  %v683_v2 = vadd.f32 %v3169_v30, %v3006_v26  ;;  %v492_v52 = vadd.f32 %v3175_v54, %v3008_v27  ;;  %v685_v58 = vadd.f32 %v3177_v42, %v3010_v0 }
 0x167   :  { %v3296_v32 = vpop.f32.mrb[30].mxu0  ;;  %v2607_v18 = vpop.eup %2606  ;;  %v1206_v8 = vadd.f32 1.0, %v2605_v45  ;;  %2618 = verf.f32 %v956_v63  ;;  %v3319_v53 = vmul.f32 %v1203_v23, %v3219_v57  ;;  %v3322_v4 = vmul.f32 %v1205_v48, %v3230_v59 }
 0x168   :  { %4181 = vst [vmem:[#allocation16_spill] sm:$0xff] %v3296_v32  ;;  %v3301_v1 = vpop.f32.mrb[30].mxu1  ;;  %v3303_v15 = vpop.f32.mrb[31].mxu0  ;;  %v959_v32 = vmul.f32 0.70710677, %v490_v37  ;;  %v1207_v9 = vadd.f32 1.0, %v2607_v18  ;;  %v3327_v45 = vmul.f32 %v1204_v51, %v3232_v17  ;;  %2620 = verf.f32 %v958_v10 }
 0x169   :  { %v3312_v36 = vpop.f32.mrb[31].mxu1  ;;  %v3324_v13 = vmul.f32 0.5, %v677_v41  ;;  %v961_v31 = vmul.f32 0.70710677, %v683_v2  ;;  %v2609_v30 = vpop.eup %2608  ;;  %v3329_v18 = vmul.f32 0.5, %v486_v43  ;;  %v3336_v57 = vmul.f32 %v1206_v8, %v3244_v46 }
 0x16a   :  { %v960_v54 = vmul.f32 0.70710677, %v492_v52  ;;  %v3338_v59 = vmul.f32 0.5, %v679_v61  ;;  %v3340_v41 = vmul.f32 0.5, %v490_v37  ;;  %2622 = verf.f32 %v959_v32  ;;  %v2611_v43 = vpop.eup %2610 }
 0x16b   :  { %v3347_v48 = vmul.f32 %v1207_v9, %v3246_v56  ;;  %2624 = verf.f32 %v961_v31  ;;  %v962_v51 = vmul.f32 0.70710677, %v685_v58  ;;  %v1440_v10 = vpack.c.bf16 %v3253_v34, %v3209_v29 }
 0x16c   :  { %v3331_v63 = vpop.f32.mrb[32].mxu0  ;;  %v3333_v42 = vpop.f32.mrb[32].mxu1  ;;  %v1209_v8 = vadd.f32 1.0, %v2609_v30  ;;  %v1442_v32 = vpack.c.bf16 %v3258_v50, %v3228_v55  ;;  %v687_v56 = vadd.f32 %v3184_v22, %v3006_v26  ;;  %2626 = verf.f32 %v960_v54 }
 0x16d   :  { %v3342_v23 = vpop.f32.mrb[33].mxu0  ;;  %v3344_v17 = vpop.f32.mrb[33].mxu1  ;;  %1806 = vmatprep.mubr.bf16.mxu0 %v1440_v10  ;;  %v1439_v34 = vpack.c.bf16 %v3239_v21, %v3187_v16  ;;  %v1441_v30 = vpack.c.bf16 %v3242_v60, %v3202_v28  ;;  %v496_v55 = vadd.f32 %v3191_v14, %v3008_v27  ;;  %v1208_v50 = vadd.f32 1.0, %v2611_v43 }
 0x16e   :  { %4182 = vst [vmem:[#allocation17_spill] sm:$0xff] %v3344_v17  ;;  %v3351_v46 = vpop.f32.mrb[34].mxu0  ;;  %v3353_v61 = vpop.f32.mrb[34].mxu1  ;;  %v494_v17 = vadd.f32 %v3182_v5, %v3004_v25  ;;  %2628 = verf.f32 %v962_v51  ;;  %1967 = vmatprep.mubr.bf16.mxu1 %v1442_v32  ;;  %v965_v54 = vmul.f32 0.70710677, %v687_v56  ;;  %v3376_v21 = vmul.f32 %v1209_v8, %v3260_v44 }
 0x16f   :  { %4183 = vst [vmem:[#allocation18_spill] sm:$0xff] %v3353_v61  ;;  %v2613_v37 = vpop.eup %2612  ;;  %v3361_v9 = vpop.f32.mrb[35].mxu0  ;;  %v3371_v61 = vmul.f32 0.5, %v683_v2  ;;  %1807 = vmatmul.mubr.bf16.gmra.mrb[72].mxu0 %v1439_v34  ;;  %1968 = vmatmul.mubr.bf16.gmra.mrb[72].mxu1 %v1441_v30  ;;  %v964_v16 = vmul.f32 0.70710677, %v496_v55  ;;  %v689_v14 = vadd.f32 %v3199_v47, %v3010_v0  ;;  %v500_v28 = vadd.f32 %v3215_v11, %v3004_v25 }
 0x170   :  { %4184 = vst [vmem:[#allocation19_spill] sm:$0xff] %v3361_v9  ;;  %v3363_v31 = vpop.f32.mrb[35].mxu1  ;;  %v2615_v29 = vpop.eup %2614  ;;  %v963_v22 = vmul.f32 0.70710677, %v494_v17  ;;  %v3373_v9 = vmul.f32 0.5, %v492_v52  ;;  %v693_v52 = vadd.f32 %v3217_v39, %v3006_v26  ;;  %v3389_v44 = vmul.f32 %v1208_v50, %v3268_v12 }
 0x171   :  { %4185 = vst [vmem:[#allocation20_spill] sm:$0xff] %v3363_v31  ;;  %v2617_v5 = vpop.eup %2616  ;;  %v1210_v31 = vadd.f32 1.0, %v2613_v37  ;;  %v1211_v2 = vadd.f32 1.0, %v2615_v29  ;;  %v3391_v37 = vmul.f32 0.5, %v685_v58  ;;  %v966_v47 = vmul.f32 0.70710677, %v689_v14 }
 0x172   :  { %2630 = verf.f32 %v963_v22  ;;  %v2619_v60 = vpop.eup %2618  ;;  %v1213_v43 = vadd.f32 1.0, %v2617_v5  ;;  %v502_v11 = vadd.f32 %v3223_v40, %v3008_v27  ;;  %v3402_v34 = vmul.f32 0.5, %v494_v17 }
 0x173   :  { %2632 = verf.f32 %v965_v54  ;;  %v2621_v29 = vpop.eup %2620  ;;  %v3400_v39 = vmul.f32 %v1210_v31, %v3279_v3  ;;  %v967_v30 = vmul.f32 0.70710677, %v500_v28  ;;  %v1212_v5 = vadd.f32 1.0, %v2619_v60 }
 0x174   :  { %v3384_v51 = vpop.f32.mrb[36].mxu0  ;;  %v3386_v10 = vpop.f32.mrb[36].mxu1  ;;  %2634 = verf.f32 %v964_v16  ;;  %v3406_v50 = vmul.f32 0.5, %v687_v56  ;;  %v3408_v22 = vmul.f32 0.5, %v496_v55  ;;  %v3415_v3 = vmul.f32 %v1211_v2, %v3308_v7 }
 0x175   :  { %v3395_v8 = vpop.f32.mrb[37].mxu0  ;;  %v3397_v32 = vpop.f32.mrb[37].mxu1  ;;  %2636 = verf.f32 %v966_v47  ;;  %v3418_v17 = vmul.f32 %v1213_v43, %v3324_v13  ;;  %v3420_v31 = vmul.f32 0.5, %v689_v14  ;;  %v969_v16 = vmul.f32 0.70710677, %v693_v52 }
 0x176   :  { %4186 = vst [vmem:[#allocation21_spill] sm:$0xff] %v3395_v8  ;;  %4187 = vst [vmem:[#allocation22_spill] sm:$0xff] %v3397_v32  ;;  %v3404_v12 = vpop.f32.mrb[38].mxu0  ;;  %v2623_v58 = vpop.eup %2622  ;;  %v1214_v56 = vadd.f32 1.0, %v2621_v29  ;;  %v3424_v55 = vmul.f32 0.5, %v500_v28  ;;  %2638 = verf.f32 %v967_v30  ;;  %v1444_v13 = vpack.c.bf16 %v3327_v45, %v3299_v6  ;;  %v4193_v30 = vld [vmem:[#allocation13_spill] sm:$0xff] }
 0x177   :  { %4188 = vst [vmem:[#allocation23_spill] sm:$0xff] %v3404_v12  ;;  %v3410_v40 = vpop.f32.mrb[38].mxu1  ;;  %v3412_v54 = vpop.f32.mrb[39].mxu0  ;;  %v968_v47 = vmul.f32 0.70710677, %v502_v11  ;;  %v3426_v12 = vmul.f32 0.5, %v693_v52  ;;  %v1446_v14 = vpack.c.bf16 %v3336_v57, %v3306_v35  ;;  %v3435_v43 = vmul.f32 %v1212_v5, %v3329_v18 }
 0x178   :  { %4189 = vst [vmem:[#allocation24_spill] sm:$0xff] %v3410_v40  ;;  %4190 = vst [vmem:[#allocation25_spill] sm:$0xff] %v3412_v54  ;;  %v2625_v32 = vpop.eup %2624  ;;  %v3422_v60 = vpop.f32.mrb[39].mxu1  ;;  %v4192_v54 = vld [vmem:[#allocation12_spill] sm:$0xff]  ;;  %v1215_v28 = vadd.f32 1.0, %v2623_v58  ;;  %2640 = verf.f32 %v969_v16  ;;  %1814 = vmatprep.mubr.bf16.mxu0 %v1444_v13  ;;  %v1443_v6 = vpack.c.bf16 %v3319_v53, %v3275_v38  ;;  %v1445_v58 = vpack.c.bf16 %v3322_v4, %v3288_v20  ;;  %v4197_v4 = vld [vmem:[#allocation15_spill] sm:$0xff] }
 0x179   :  { %4191 = vst [vmem:[#allocation26_spill] sm:$0xff] %v3422_v60  ;;  %v2627_v40 = vpop.eup %2626  ;;  %v695_v7 = vadd.f32 %v4192_v54, %v3010_v0  ;;  %v1217_v29 = vadd.f32 1.0, %v2625_v32  ;;  %v504_v60 = vadd.f32 %v4193_v30, %v3004_v25  ;;  %1975 = vmatprep.mubr.bf16.mxu1 %v1446_v14  ;;  %v4194_v54 = vld [vmem:[#allocation14_spill] sm:$0xff]  ;;  %2642 = verf.f32 %v968_v47 }
 0x17a   :  { %v2629_v2 = vpop.eup %2628  ;;  %v697_v8 = vadd.f32 %v4194_v54, %v3006_v26  ;;  %v1216_v57 = vadd.f32 1.0, %v2627_v40  ;;  %v3454_v14 = vmul.f32 %v1214_v56, %v3338_v59  ;;  %1815 = vmatmul.mubr.bf16.gmra.mrb[76].mxu0 %v1443_v6  ;;  %v3460_v47 = vmul.f32 0.5, %v502_v11  ;;  %1976 = vmatmul.mubr.bf16.gmra.mrb[76].mxu1 %v1445_v58 }
 0x17b   :  { %v970_v52 = vmul.f32 0.70710677, %v695_v7  ;;  %v971_v32 = vmul.f32 0.70710677, %v504_v60  ;;  %v1218_v38 = vadd.f32 1.0, %v2629_v2  ;;  %v506_v20 = vadd.f32 %v3248_v33, %v3008_v27 }
 0x17c   :  { %v3443_v35 = vpop.f32.mrb[40].mxu0  ;;  %v3445_v45 = vpop.f32.mrb[40].mxu1  ;;  %v973_v53 = vmul.f32 0.70710677, %v697_v8  ;;  %v699_v54 = vadd.f32 %v4197_v4, %v3010_v0  ;;  %v510_v11 = vadd.f32 %v3277_v19, %v3004_v25  ;;  %v3476_v58 = vmul.f32 %v1217_v29, %v3371_v61 }
 0x17d   :  { %v2631_v18 = vpop.eup %2630  ;;  %v3449_v5 = vpop.f32.mrb[41].mxu0  ;;  %2644 = verf.f32 %v970_v52  ;;  %v3471_v52 = vmul.f32 %v1215_v28, %v3340_v41  ;;  %v3479_v33 = vmul.f32 %v1216_v57, %v3373_v9  ;;  %v3486_v41 = vmul.f32 0.5, %v504_v60 }
 0x17e   :  { %v3451_v16 = vpop.f32.mrb[41].mxu1  ;;  %v2633_v13 = vpop.eup %2632  ;;  %2646 = verf.f32 %v971_v32  ;;  %v1219_v6 = vadd.f32 1.0, %v2631_v18  ;;  %v974_v28 = vmul.f32 0.70710677, %v699_v54  ;;  %v3488_v19 = vmul.f32 0.5, %v697_v8 }
 0x17f   :  { %v3456_v30 = vpop.f32.mrb[42].mxu0  ;;  %v3458_v40 = vpop.f32.mrb[42].mxu1  ;;  %2648 = verf.f32 %v973_v53  ;;  %v1221_v4 = vadd.f32 1.0, %v2633_v13  ;;  %v703_v61 = vadd.f32 %v3283_v49, %v3006_v26  ;;  %v3504_v8 = vmul.f32 0.5, %v506_v20 }
 0x180   :  { %4195 = vst [vmem:[#allocation12_spill] sm:$0xff] %v3456_v30  ;;  %4196 = vst [vmem:[#allocation13_spill] sm:$0xff] %v3458_v40  ;;  %v3466_v59 = vpop.f32.mrb[43].mxu0  ;;  %v3468_v56 = vpop.f32.mrb[43].mxu1  ;;  %v3484_v40 = vmul.f32 0.5, %v695_v7  ;;  %v3493_v9 = vmul.f32 %v1219_v6, %v3402_v34 }
 0x181   :  { %4198 = vst [vmem:[#allocation14_spill] sm:$0xff] %v3466_v59  ;;  %4199 = vst [vmem:[#allocation15_spill] sm:$0xff] %v3468_v56  ;;  %v2635_v2 = vpop.eup %2634  ;;  %v972_v59 = vmul.f32 0.70710677, %v506_v20  ;;  %v3482_v56 = vmul.f32 %v1218_v38, %v3391_v37  ;;  %v975_v30 = vmul.f32 0.70710677, %v510_v11  ;;  %v512_v37 = vadd.f32 %v3285_v24, %v3008_v27 }
 0x182   :  { %v2637_v32 = vpop.eup %2636  ;;  %v1220_v53 = vadd.f32 1.0, %v2635_v2  ;;  %v3502_v57 = vmul.f32 %v1221_v4, %v3406_v50  ;;  %v977_v13 = vmul.f32 0.70710677, %v703_v61  ;;  %v3510_v2 = vmul.f32 0.5, %v699_v54 }
 0x183   :  { %v2639_v18 = vpop.eup %2638  ;;  %v1222_v29 = vadd.f32 1.0, %v2637_v32  ;;  %2650 = verf.f32 %v972_v59  ;;  %v976_v24 = vmul.f32 0.70710677, %v512_v37  ;;  %v705_v4 = vadd.f32 %v3294_v62, %v3010_v0 }
 0x184   :  { %v3497_v7 = vpop.f32.mrb[44].mxu0  ;;  %v3499_v60 = vpop.f32.mrb[44].mxu1  ;;  %2652 = verf.f32 %v974_v28  ;;  %v1223_v59 = vadd.f32 1.0, %v2639_v18  ;;  %v3517_v20 = vmul.f32 %v1220_v53, %v3408_v22  ;;  %v1448_v28 = vpack.c.bf16 %v3435_v43, %v3389_v44  ;;  %v4205_v22 = vld [vmem:[#allocation16_spill] sm:$0xff] }
 0x185   :  { %v3506_v49 = vpop.f32.mrb[45].mxu0  ;;  %v3508_v34 = vpop.f32.mrb[45].mxu1  ;;  %2654 = verf.f32 %v975_v30  ;;  %v1450_v54 = vpack.c.bf16 %v3454_v14, %v3400_v39  ;;  %v514_v53 = vadd.f32 %v4205_v22, %v3004_v25  ;;  %v707_v62 = vadd.f32 %v3301_v1, %v3006_v26 }
 0x186   :  { %4200 = vst [vmem:[#allocation27_spill] sm:$0xff] %v3508_v34  ;;  %v2641_v38 = vpop.eup %2640  ;;  %v3512_v6 = vpop.f32.mrb[46].mxu0  ;;  %v3532_v34 = vmul.f32 0.5, %v510_v11  ;;  %2656 = verf.f32 %v977_v13  ;;  %v978_v39 = vmul.f32 0.70710677, %v705_v4  ;;  %1822 = vmatprep.mubr.bf16.mxu0 %v1448_v28  ;;  %v1447_v14 = vpack.c.bf16 %v3415_v3, %v3347_v48 }
 0x187   :  { %4201 = vst [vmem:[#allocation28_spill] sm:$0xff] %v3512_v6  ;;  %v3514_v32 = vpop.f32.mrb[46].mxu1  ;;  %v2643_v50 = vpop.eup %2642  ;;  %v1225_v43 = vadd.f32 1.0, %v2641_v38  ;;  %1983 = vmatprep.mubr.bf16.mxu1 %v1450_v54  ;;  %v3543_v11 = vmul.f32 0.5, %v703_v61  ;;  %2658 = verf.f32 %v976_v24  ;;  %v981_v1 = vmul.f32 0.70710677, %v707_v62 }
 0x188   :  { %4202 = vst [vmem:[#allocation29_spill] sm:$0xff] %v3514_v32  ;;  %v3525_v18 = vpop.f32.mrb[47].mxu0  ;;  %v3527_v30 = vpop.f32.mrb[47].mxu1  ;;  %v3530_v32 = vmul.f32 %v1222_v29, %v3420_v31  ;;  %v3541_v31 = vmul.f32 %v1223_v59, %v3424_v55  ;;  %v979_v29 = vmul.f32 0.70710677, %v514_v53  ;;  %v1224_v22 = vadd.f32 1.0, %v2643_v50  ;;  %1823 = vmatmul.mubr.bf16.gmra.mrb[80].mxu0 %v1447_v14 }
 0x189   :  { %4203 = vst [vmem:[#allocation30_spill] sm:$0xff] %v3525_v18  ;;  %4204 = vst [vmem:[#allocation31_spill] sm:$0xff] %v3527_v30  ;;  %v2645_v6 = vpop.eup %2644  ;;  %2660 = verf.f32 %v978_v39  ;;  %v1449_v38 = vpack.c.bf16 %v3418_v17, %v3376_v21  ;;  %v516_v48 = vadd.f32 %v3303_v15, %v3008_v27  ;;  %v709_v59 = vadd.f32 %v3312_v36, %v3010_v0 }
 0x18a   :  { %v2647_v44 = vpop.eup %2646  ;;  %v1226_v18 = vadd.f32 1.0, %v2645_v6  ;;  %2662 = verf.f32 %v979_v29  ;;  %v520_v24 = vadd.f32 %v3331_v63, %v3004_v25  ;;  %v3562_v17 = vmul.f32 %v1225_v43, %v3426_v12 }
 0x18b   :  { %v2649_v30 = vpop.eup %2648  ;;  %v1227_v13 = vadd.f32 1.0, %v2647_v44  ;;  %2664 = verf.f32 %v981_v1  ;;  %v3564_v15 = vmul.f32 0.5, %v512_v37  ;;  %1984 = vmatmul.mubr.bf16.gmra.mrb[80].mxu1 %v1449_v38  ;;  %v980_v28 = vmul.f32 0.70710677, %v516_v48 }
 0x18c   :  { %v3549_v3 = vpop.f32.mrb[48].mxu0  ;;  %v3551_v55 = vpop.f32.mrb[48].mxu1  ;;  %v1229_v61 = vadd.f32 1.0, %v2649_v30  ;;  %v713_v54 = vadd.f32 %v3333_v42, %v3006_v26  ;;  %v3573_v44 = vmul.f32 %v1224_v22, %v3460_v47  ;;  %v3575_v39 = vmul.f32 0.5, %v705_v4 }
 0x18d   :  { %v3557_v6 = vpop.f32.mrb[49].mxu0  ;;  %v3559_v50 = vpop.f32.mrb[49].mxu1  ;;  %v3577_v14 = vmul.f32 0.5, %v514_v53  ;;  %v982_v12 = vmul.f32 0.70710677, %v709_v59  ;;  %v3582_v29 = vmul.f32 %v1226_v18, %v3484_v40  ;;  %v3584_v42 = vmul.f32 0.5, %v707_v62 }
 0x18e   :  { %v2651_v21 = vpop.eup %2650  ;;  %v3568_v30 = vpop.f32.mrb[50].mxu0  ;;  %2666 = verf.f32 %v980_v28  ;;  %v983_v1 = vmul.f32 0.70710677, %v520_v24  ;;  %v3589_v47 = vmul.f32 %v1227_v13, %v3486_v41  ;;  %v3592_v4 = vmul.f32 %v1229_v61, %v3488_v19  ;;  %v4209_v28 = vld [vmem:[#allocation17_spill] sm:$0xff] }
 0x18f   :  { %v3570_v36 = vpop.f32.mrb[50].mxu1  ;;  %v2653_v63 = vpop.eup %2652  ;;  %v1228_v53 = vadd.f32 1.0, %v2651_v21  ;;  %v985_v22 = vmul.f32 0.70710677, %v713_v54  ;;  %2668 = verf.f32 %v982_v12  ;;  %v522_v40 = vadd.f32 %v3342_v23, %v3008_v27 }
 0x190   :  { %4206 = vst [vmem:[#allocation16_spill] sm:$0xff] %v3570_v36  ;;  %v3579_v37 = vpop.f32.mrb[51].mxu0  ;;  %v2655_v43 = vpop.eup %2654  ;;  %v1230_v36 = vadd.f32 1.0, %v2653_v63  ;;  %2670 = verf.f32 %v983_v1  ;;  %v1452_v41 = vpack.c.bf16 %v3517_v20, %v3479_v33  ;;  %v3602_v13 = vmul.f32 0.5, %v709_v59 }
 0x191   :  { %4207 = vst [vmem:[#allocation32_spill] sm:$0xff] %v3579_v37  ;;  %v3586_v38 = vpop.f32.mrb[51].mxu1  ;;  %v3594_v37 = vmul.f32 0.5, %v516_v48  ;;  %v2657_v18 = vpop.eup %2656  ;;  %v1231_v62 = vadd.f32 1.0, %v2655_v43  ;;  %v3604_v61 = vmul.f32 0.5, %v520_v24  ;;  %v1454_v21 = vpack.c.bf16 %v3530_v32, %v3482_v56 }
 0x192   :  { %4208 = vst [vmem:[#allocation33_spill] sm:$0xff] %v3586_v38  ;;  %v715_v38 = vadd.f32 %v4209_v28, %v3010_v0  ;;  %v2659_v19 = vpop.eup %2658  ;;  %v984_v48 = vmul.f32 0.70710677, %v522_v40  ;;  %v3613_v43 = vmul.f32 %v1228_v53, %v3504_v8  ;;  %2672 = verf.f32 %v985_v22  ;;  %1830 = vmatprep.mubr.bf16.mxu0 %v1452_v41  ;;  %v4213_v8 = vld [vmem:[#allocation18_spill] sm:$0xff] }
 0x193   :  { %v2661_v12 = vpop.eup %2660  ;;  %v524_v33 = vadd.f32 %v3351_v46, %v3004_v25  ;;  %v3622_v56 = vmul.f32 %v1230_v36, %v3510_v2  ;;  %v3624_v32 = vmul.f32 0.5, %v713_v54  ;;  %1991 = vmatprep.mubr.bf16.mxu1 %v1454_v21  ;;  %v717_v53 = vadd.f32 %v4213_v8, %v3006_v26 }
 0x194   :  { %v3608_v63 = vpop.f32.mrb[52].mxu0  ;;  %v3610_v23 = vpop.f32.mrb[52].mxu1  ;;  %v986_v1 = vmul.f32 0.70710677, %v715_v38  ;;  %v1451_v22 = vpack.c.bf16 %v3493_v9, %v3471_v52  ;;  %2674 = verf.f32 %v984_v48  ;;  %v1232_v21 = vadd.f32 1.0, %v2659_v19 }
 0x195   :  { %4210 = vst [vmem:[#allocation17_spill] sm:$0xff] %v3610_v23  ;;  %v3617_v20 = vpop.f32.mrb[53].mxu0  ;;  %v3619_v59 = vpop.f32.mrb[53].mxu1  ;;  %v987_v2 = vmul.f32 0.70710677, %v524_v33  ;;  %v1234_v8 = vadd.f32 1.0, %v2661_v12  ;;  %v1453_v9 = vpack.c.bf16 %v3502_v57, %v3476_v58  ;;  %v530_v19 = vadd.f32 %v3384_v51, %v3004_v25 }
 0x196   :  { %4211 = vst [vmem:[#allocation34_spill] sm:$0xff] %v3617_v20  ;;  %4212 = vst [vmem:[#allocation35_spill] sm:$0xff] %v3619_v59  ;;  %v2663_v24 = vpop.eup %2662  ;;  %v3630_v28 = vpop.f32.mrb[54].mxu0  ;;  %v3635_v59 = vmul.f32 %v1231_v62, %v3532_v34  ;;  %v1233_v20 = vadd.f32 1.0, %v2657_v18  ;;  %2676 = verf.f32 %v986_v1  ;;  %v989_v23 = vmul.f32 0.70710677, %v717_v53  ;;  %1831 = vmatmul.mubr.bf16.gmra.mrb[84].mxu0 %v1451_v22 }
 0x197   :  { %v3632_v46 = vpop.f32.mrb[54].mxu1  ;;  %v2665_v41 = vpop.eup %2664  ;;  %v1235_v52 = vadd.f32 1.0, %v2663_v24  ;;  %2678 = verf.f32 %v987_v2  ;;  %v4216_v34 = vld [vmem:[#allocation19_spill] sm:$0xff]  ;;  %v3652_v1 = vmul.f32 0.5, %v522_v40  ;;  %1992 = vmatmul.mubr.bf16.gmra.mrb[84].mxu1 %v1453_v9  ;;  %v723_v58 = vadd.f32 %v3386_v10, %v3006_v26 }
 0x198   :  { %4214 = vst [vmem:[#allocation18_spill] sm:$0xff] %v3632_v46  ;;  %v3637_v54 = vpop.f32.mrb[55].mxu0  ;;  %v3639_v36 = vpop.f32.mrb[55].mxu1  ;;  %v526_v62 = vadd.f32 %v4216_v34, %v3008_v27  ;;  %v1237_v48 = vadd.f32 1.0, %v2665_v41  ;;  %2680 = verf.f32 %v989_v23  ;;  %v3650_v12 = vmul.f32 %v1233_v20, %v3543_v11 }
 0x199   :  { %4215 = vst [vmem:[#allocation36_spill] sm:$0xff] %v3637_v54  ;;  %v2667_v18 = vpop.eup %2666  ;;  %v4217_v54 = vld [vmem:[#allocation20_spill] sm:$0xff]  ;;  %v3657_v22 = vmul.f32 %v1232_v21, %v3564_v15  ;;  %v3659_v23 = vmul.f32 0.5, %v715_v38  ;;  %v3661_v41 = vmul.f32 0.5, %v524_v33  ;;  %v3666_v40 = vmul.f32 %v1234_v8, %v3575_v39 }
 0x19a   :  { %v719_v46 = vadd.f32 %v4217_v54, %v3010_v0  ;;  %v988_v24 = vmul.f32 0.70710677, %v526_v62  ;;  %v2669_v57 = vpop.eup %2668  ;;  %v1236_v20 = vadd.f32 1.0, %v2667_v18  ;;  %v3668_v54 = vmul.f32 0.5, %v717_v53 }
 0x19b   :  { %v2671_v11 = vpop.eup %2670  ;;  %v3675_v15 = vmul.f32 %v1235_v52, %v3577_v14  ;;  %v3678_v38 = vmul.f32 %v1237_v48, %v3584_v42  ;;  %v991_v33 = vmul.f32 0.70710677, %v530_v19  ;;  %v1238_v53 = vadd.f32 1.0, %v2669_v57  ;;  %v4226_v52 = vld [vmem:[#allocation22_spill] sm:$0xff] }
 0x19c   :  { %v990_v2 = vmul.f32 0.70710677, %v719_v46  ;;  %v3663_v51 = vpop.f32.mrb[56].mxu0  ;;  %2682 = verf.f32 %v988_v24  ;;  %v3670_v10 = vpop.f32.mrb[56].mxu1  ;;  %v3684_v34 = vmul.f32 0.5, %v526_v62  ;;  %v4223_v24 = vld [vmem:[#allocation21_spill] sm:$0xff]  ;;  %v725_v48 = vadd.f32 %v4226_v52, %v3010_v0 }
 0x19d   :  { %4218 = vst [vmem:[#allocation19_spill] sm:$0xff] %v3663_v51  ;;  %4219 = vst [vmem:[#allocation20_spill] sm:$0xff] %v3670_v10  ;;  %v3672_v9 = vpop.f32.mrb[57].mxu0  ;;  %v3680_v21 = vpop.f32.mrb[57].mxu1  ;;  %v993_v18 = vmul.f32 0.70710677, %v723_v58  ;;  %v1458_v57 = vpack.c.bf16 %v3622_v56, %v3582_v29  ;;  %v3710_v56 = vmul.f32 %v1238_v53, %v3602_v13 }
 0x19e   :  { %4220 = vst [vmem:[#allocation37_spill] sm:$0xff] %v3672_v9  ;;  %2684 = verf.f32 %v990_v2  ;;  %4221 = vst [vmem:[#allocation38_spill] sm:$0xff] %v3680_v21  ;;  %v3682_v39 = vpop.f32.mrb[58].mxu0  ;;  %v2673_v8 = vpop.eup %2672  ;;  %v532_v9 = vadd.f32 %v4223_v24, %v3008_v27  ;;  %v1239_v42 = vadd.f32 1.0, %v2671_v11  ;;  %v1456_v2 = vpack.c.bf16 %v3613_v43, %v3573_v44  ;;  %v4227_v44 = vld [vmem:[#allocation23_spill] sm:$0xff] }
 0x19f   :  { %4222 = vst [vmem:[#allocation39_spill] sm:$0xff] %v3682_v39  ;;  %v3688_v10 = vpop.f32.mrb[58].mxu1  ;;  %v3690_v14 = vpop.f32.mrb[59].mxu0  ;;  %v3701_v21 = vmul.f32 %v1236_v20, %v3594_v37  ;;  %v3703_v24 = vmul.f32 0.5, %v719_v46  ;;  %v1241_v51 = vadd.f32 1.0, %v2673_v8  ;;  %2686 = verf.f32 %v991_v33  ;;  %1999 = vmatprep.mubr.bf16.mxu1 %v1458_v57  ;;  %v4228_v37 = vld [vmem:[#allocation24_spill] sm:$0xff] }
 0x1a0   :  { %4224 = vst [vmem:[#allocation21_spill] sm:$0xff] %v3688_v10  ;;  %4225 = vst [vmem:[#allocation40_spill] sm:$0xff] %v3690_v14  ;;  %v3698_v62 = vpop.f32.mrb[59].mxu1  ;;  %v2675_v39 = vpop.eup %2674  ;;  %v3705_v10 = vmul.f32 0.5, %v530_v19  ;;  %v992_v11 = vmul.f32 0.70710677, %v532_v9  ;;  %1838 = vmatprep.mubr.bf16.mxu0 %v1456_v2  ;;  %v534_v29 = vadd.f32 %v4227_v44, %v3004_v25  ;;  %2688 = verf.f32 %v993_v18 }
 0x1a1   :  { %v2677_v14 = vpop.eup %2676  ;;  %v994_v52 = vmul.f32 0.70710677, %v725_v48  ;;  %v727_v46 = vadd.f32 %v4228_v37, %v3006_v26  ;;  %v1455_v19 = vpack.c.bf16 %v3589_v47, %v3541_v31  ;;  %v3717_v33 = vmul.f32 %v1239_v42, %v3604_v61  ;;  %v4230_v47 = vld [vmem:[#allocation25_spill] sm:$0xff] }
 0x1a2   :  { %v2679_v43 = vpop.eup %2678  ;;  %v1240_v8 = vadd.f32 1.0, %v2675_v39  ;;  %v3719_v2 = vmul.f32 0.5, %v723_v58  ;;  %2690 = verf.f32 %v992_v11  ;;  %v1242_v13 = vadd.f32 1.0, %v2677_v14  ;;  %v4231_v58 = vld [vmem:[#allocation26_spill] sm:$0xff] }
 0x1a3   :  { %v2681_v20 = vpop.eup %2680  ;;  %2692 = verf.f32 %v994_v52  ;;  %v995_v53 = vmul.f32 0.70710677, %v534_v29  ;;  %v997_v18 = vmul.f32 0.70710677, %v727_v46  ;;  %1839 = vmatmul.mubr.bf16.gmra.mrb[88].mxu0 %v1455_v19  ;;  %v3726_v37 = vmul.f32 %v1241_v51, %v3624_v32 }
 0x1a4   :  { %v3721_v57 = vpop.f32.mrb[60].mxu0  ;;  %v3723_v44 = vpop.f32.mrb[60].mxu1  ;;  %v1457_v31 = vpack.c.bf16 %v3592_v4, %v3562_v17  ;;  %v536_v61 = vadd.f32 %v4230_v47, %v3008_v27  ;;  %v729_v39 = vadd.f32 %v4231_v58, %v3010_v0  ;;  %v1243_v52 = vadd.f32 1.0, %v2679_v43 }
 0x1a5   :  { %4229 = vst [vmem:[#allocation22_spill] sm:$0xff] %v3723_v44  ;;  %v3734_v42 = vpop.f32.mrb[61].mxu0  ;;  %v3736_v11 = vpop.f32.mrb[61].mxu1  ;;  %v1245_v44 = vadd.f32 1.0, %v2681_v20  ;;  %2694 = verf.f32 %v995_v53  ;;  %v540_v32 = vadd.f32 %v3443_v35, %v3004_v25  ;;  %v3744_v19 = vmul.f32 0.5, %v532_v9 }
 0x1a6   :  { %4232 = vst [vmem:[#allocation23_spill] sm:$0xff] %v3736_v11  ;;  %v2683_v14 = vpop.eup %2682  ;;  %v3740_v51 = vpop.f32.mrb[62].mxu0  ;;  %2696 = verf.f32 %v997_v18  ;;  %2000 = vmatmul.mubr.bf16.gmra.mrb[88].mxu1 %v1457_v31  ;;  %v996_v47 = vmul.f32 0.70710677, %v536_v61  ;;  %v733_v58 = vadd.f32 %v3445_v45, %v3006_v26  ;;  %v3753_v20 = vmul.f32 %v1240_v8, %v3652_v1 }
 0x1a7   :  { %4233 = vst [vmem:[#allocation24_spill] sm:$0xff] %v3740_v51  ;;  %v3742_v17 = vpop.f32.mrb[62].mxu1  ;;  %v3748_v11 = vpop.f32.mrb[63].mxu0  ;;  %v3756_v35 = vmul.f32 %v1242_v13, %v3659_v23  ;;  %v3758_v53 = vmul.f32 0.5, %v725_v48  ;;  %v998_v9 = vmul.f32 0.70710677, %v729_v39  ;;  %v3765_v45 = vmul.f32 %v1243_v52, %v3661_v41 }
 0x1a8   :  { %4234 = vst [vmem:[#allocation25_spill] sm:$0xff] %v3742_v17  ;;  %v2685_v4 = vpop.eup %2684  ;;  %v3750_v43 = vpop.f32.mrb[63].mxu1  ;;  %v1244_v17 = vadd.f32 1.0, %v2683_v14  ;;  %v3760_v18 = vmul.f32 0.5, %v534_v29  ;;  %v3762_v31 = vmul.f32 0.5, %v727_v46  ;;  %2698 = verf.f32 %v996_v47 }
 0x1a9   :  { %4235 = vst [vmem:[#allocation26_spill] sm:$0xff] %v3750_v43  ;;  %v999_v51 = vmul.f32 0.70710677, %v540_v32  ;;  %v3768_v43 = vmul.f32 %v1245_v44, %v3668_v54  ;;  %v1246_v1 = vadd.f32 1.0, %v2685_v4  ;;  %v2687_v8 = vpop.eup %2686  ;;  %v3770_v23 = vmul.f32 0.5, %v536_v61 }
 0x1aa   :  { %2700 = verf.f32 %v998_v9  ;;  %v1001_v48 = vmul.f32 0.70710677, %v733_v58  ;;  %v542_v29 = vadd.f32 %v3449_v5, %v3008_v27  ;;  %v2689_v13 = vpop.eup %2688  ;;  %v735_v46 = vadd.f32 %v3451_v16, %v3010_v0 }
 0x1ab   :  { %2702 = verf.f32 %v999_v51  ;;  %v1460_v41 = vpack.c.bf16 %v3701_v21, %v3657_v22  ;;  %v1462_v54 = vpack.c.bf16 %v3710_v56, %v3666_v40  ;;  %v3781_v61 = vmul.f32 %v1244_v17, %v3684_v34  ;;  %v4236_v22 = vld [vmem:[#allocation12_spill] sm:$0xff]  ;;  %v4237_v34 = vld [vmem:[#allocation13_spill] sm:$0xff] }
 0x1ac   :  { %v2691_v44 = vpop.eup %2690  ;;  %v3783_v14 = vmul.f32 0.5, %v729_v39  ;;  %v3785_v52 = vmul.f32 0.5, %v540_v32  ;;  %v1000_v5 = vmul.f32 0.70710677, %v542_v29  ;;  %v3788_v51 = vmul.f32 %v1246_v1, %v3703_v24 }
 0x1ad   :  { %v2693_v4 = vpop.eup %2692  ;;  %v1247_v16 = vadd.f32 1.0, %v2687_v8  ;;  %v1002_v47 = vmul.f32 0.70710677, %v735_v46  ;;  %1846 = vmatprep.mubr.bf16.mxu0 %v1460_v41  ;;  %2007 = vmatprep.mubr.bf16.mxu1 %v1462_v54  ;;  %v544_v40 = vadd.f32 %v4236_v22, %v3004_v25  ;;  %v3792_v21 = vmul.f32 0.5, %v733_v58  ;;  %v4238_v54 = vld [vmem:[#allocation14_spill] sm:$0xff] }
 0x1ae   :  { %2704 = verf.f32 %v1001_v48  ;;  %v737_v56 = vadd.f32 %v4237_v34, %v3006_v26  ;;  %v1459_v39 = vpack.c.bf16 %v3675_v15, %v3635_v59  ;;  %v1249_v17 = vadd.f32 1.0, %v2689_v13  ;;  %v4239_v59 = vld [vmem:[#allocation15_spill] sm:$0xff] }
 0x1af   :  { %v2695_v32 = vpop.eup %2694  ;;  %v1248_v24 = vadd.f32 1.0, %v2691_v44  ;;  %2706 = verf.f32 %v1000_v5  ;;  %v1003_v9 = vmul.f32 0.70710677, %v544_v40  ;;  %v1250_v8 = vadd.f32 1.0, %v2693_v4 }
 0x1b0   :  { %v2697_v1 = vpop.eup %2696  ;;  %2708 = verf.f32 %v1002_v47  ;;  %v1005_v41 = vmul.f32 0.70710677, %v737_v56  ;;  %1847 = vmatmul.mubr.bf16.gmra.mrb[92].mxu0 %v1459_v39  ;;  %v1461_v58 = vpack.c.bf16 %v3678_v38, %v3650_v12  ;;  %v1251_v48 = vadd.f32 1.0, %v2695_v32 }
 0x1b1   :  { %2710 = verf.f32 %v1003_v9  ;;  %v546_v22 = vadd.f32 %v4238_v54, %v3008_v27  ;;  %v739_v15 = vadd.f32 %v4239_v59, %v3010_v0  ;;  %v3805_v13 = vmul.f32 %v1247_v16, %v3705_v10 }
 0x1b2   :  { %v1253_v44 = vadd.f32 1.0, %v2697_v1  ;;  %2712 = verf.f32 %v1005_v41  ;;  %2008 = vmatmul.mubr.bf16.gmra.mrb[92].mxu1 %v1461_v58  ;;  %v550_v5 = vadd.f32 %v3497_v7, %v3004_v25  ;;  %v2699_v4 = vpop.eup %2698  ;;  %v3810_v12 = vmul.f32 %v1249_v17, %v3719_v2 }
 0x1b3   :  { %v3812_v38 = vmul.f32 0.5, %v542_v29  ;;  %v1004_v47 = vmul.f32 0.70710677, %v546_v22  ;;  %v743_v34 = vadd.f32 %v3499_v60, %v3006_v26  ;;  %v3817_v10 = vmul.f32 %v1248_v24, %v3744_v19 }
 0x1b4   :  { %v2701_v39 = vpop.eup %2700  ;;  %v3820_v16 = vmul.f32 %v1250_v8, %v3758_v53  ;;  %v3822_v32 = vmul.f32 0.5, %v735_v46  ;;  %v1006_v7 = vmul.f32 0.70710677, %v739_v15  ;;  %v3825_v2 = vmul.f32 %v1251_v48, %v3760_v18 }
 0x1b5   :  { %v2703_v9 = vpop.eup %2702  ;;  %v3827_v29 = vmul.f32 0.5, %v544_v40  ;;  %v3829_v17 = vmul.f32 0.5, %v737_v56  ;;  %v1007_v1 = vmul.f32 0.70710677, %v550_v5  ;;  %v3832_v60 = vmul.f32 %v1253_v44, %v3762_v31  ;;  %v4240_v40 = vld [vmem:[#allocation27_spill] sm:$0xff] }
 0x1b6   :  { %v1252_v19 = vadd.f32 1.0, %v2699_v4  ;;  %v3834_v24 = vmul.f32 0.5, %v546_v22  ;;  %2714 = verf.f32 %v1004_v47  ;;  %v1254_v53 = vadd.f32 1.0, %v2701_v39 }
 0x1b7   :  { %2716 = verf.f32 %v1006_v7  ;;  %v1009_v46 = vmul.f32 0.70710677, %v743_v34  ;;  %v552_v8 = vadd.f32 %v3506_v49, %v3008_v27  ;;  %v1255_v41 = vadd.f32 1.0, %v2703_v9 }
 0x1b8   :  { %v2705_v18 = vpop.eup %2704  ;;  %v745_v56 = vadd.f32 %v4240_v40, %v3010_v0  ;;  %v1464_v58 = vpack.c.bf16 %v3781_v61, %v3753_v20  ;;  %v1466_v31 = vpack.c.bf16 %v3788_v51, %v3756_v35  ;;  %v3844_v54 = vmul.f32 0.5, %v739_v15  ;;  %v4241_v20 = vld [vmem:[#allocation28_spill] sm:$0xff]  ;;  %v4242_v15 = vld [vmem:[#allocation29_spill] sm:$0xff] }
 0x1b9   :  { %v2707_v48 = vpop.eup %2706  ;;  %v3846_v22 = vmul.f32 0.5, %v550_v5  ;;  %2718 = verf.f32 %v1007_v1  ;;  %v1008_v59 = vmul.f32 0.70710677, %v552_v8  ;;  %v3849_v49 = vmul.f32 %v1252_v19, %v3770_v23 }
 0x1ba   :  { %v2709_v44 = vpop.eup %2708  ;;  %2720 = verf.f32 %v1009_v46  ;;  %v1010_v4 = vmul.f32 0.70710677, %v745_v56  ;;  %1854 = vmatprep.mubr.bf16.mxu0 %v1464_v58  ;;  %2015 = vmatprep.mubr.bf16.mxu1 %v1466_v31  ;;  %v554_v61 = vadd.f32 %v4241_v20, %v3004_v25  ;;  %v1382_v35 = vmul.f32 %v1254_v53, %v3783_v14 }
 0x1bb   :  { %v2711_v47 = vpop.eup %2710  ;;  %v1257_v51 = vadd.f32 1.0, %v2705_v18  ;;  %v747_v5 = vadd.f32 %v4242_v15, %v3006_v26  ;;  %v1463_v39 = vpack.c.bf16 %v3765_v45, %v3717_v33  ;;  %v3859_v23 = vmul.f32 %v1255_v41, %v3785_v52  ;;  %v4243_v18 = vld [vmem:[#allocation30_spill] sm:$0xff]  ;;  %v4244_v45 = vld [vmem:[#allocation31_spill] sm:$0xff] }
 0x1bc   :  { %v2713_v7 = vpop.eup %2712  ;;  %v1256_v9 = vadd.f32 1.0, %v2707_v48  ;;  %v3861_v1 = vmul.f32 0.5, %v743_v34  ;;  %2722 = verf.f32 %v1008_v59  ;;  %v1258_v19 = vadd.f32 1.0, %v2709_v44 }
 0x1bd   :  { %2724 = verf.f32 %v1010_v4  ;;  %v1011_v46 = vmul.f32 0.70710677, %v554_v61  ;;  %v1013_v40 = vmul.f32 0.70710677, %v747_v5  ;;  %1855 = vmatmul.mubr.bf16.gmra.mrb[96].mxu0 %v1463_v39  ;;  %v1259_v14 = vadd.f32 1.0, %v2711_v47 }
 0x1be   :  { %v1465_v53 = vpack.c.bf16 %v3768_v43, %v3726_v37  ;;  %v556_v33 = vadd.f32 %v4243_v18, %v3008_v27  ;;  %v749_v52 = vadd.f32 %v4244_v45, %v3010_v0  ;;  %v1261_v41 = vadd.f32 1.0, %v2713_v7 }
 0x1bf   :  { %2726 = verf.f32 %v1011_v46  ;;  %v560_v34 = vadd.f32 %v3549_v3, %v3004_v25  ;;  %v753_v58 = vadd.f32 %v3551_v55, %v3006_v26  ;;  %v3874_v48 = vmul.f32 %v1257_v51, %v3792_v21 }
 0x1c0   :  { %v2715_v31 = vpop.eup %2714  ;;  %v3876_v59 = vmul.f32 0.5, %v552_v8  ;;  %2728 = verf.f32 %v1013_v40  ;;  %2016 = vmatmul.mubr.bf16.gmra.mrb[96].mxu1 %v1465_v53  ;;  %v1012_v37 = vmul.f32 0.70710677, %v556_v33  ;;  %v3879_v44 = vmul.f32 %v1256_v9, %v3812_v38 }
 0x1c1   :  { %v2717_v43 = vpop.eup %2716  ;;  %v3882_v4 = vmul.f32 %v1258_v19, %v3822_v32  ;;  %v3884_v3 = vmul.f32 0.5, %v745_v56  ;;  %v1014_v20 = vmul.f32 0.70710677, %v749_v52  ;;  %v3886_v55 = vmul.f32 0.5, %v554_v61 }
 0x1c2   :  { %v3888_v47 = vmul.f32 0.5, %v747_v5  ;;  %2730 = verf.f32 %v1012_v37  ;;  %v1015_v21 = vmul.f32 0.70710677, %v560_v34  ;;  %v3891_v51 = vmul.f32 %v1259_v14, %v3827_v29 }
 0x1c3   :  { %v2719_v8 = vpop.eup %2718  ;;  %v3894_v15 = vmul.f32 %v1261_v41, %v3829_v17  ;;  %2732 = verf.f32 %v1014_v20  ;;  %v1017_v38 = vmul.f32 0.70710677, %v753_v58  ;;  %v1260_v39 = vadd.f32 1.0, %v2715_v31 }
 0x1c4   :  { %v2721_v32 = vpop.eup %2720  ;;  %v1262_v56 = vadd.f32 1.0, %v2717_v43  ;;  %2734 = verf.f32 %v1015_v21  ;;  %v562_v61 = vadd.f32 %v3557_v6, %v3008_v27  ;;  %v3898_v5 = vmul.f32 0.5, %v556_v33 }
 0x1c5   :  { %v755_v7 = vadd.f32 %v3559_v50, %v3010_v0  ;;  %v1468_v29 = vpack.c.bf16 %v3849_v49, %v3817_v10  ;;  %v1470_v17 = vpack.c.bf16 %v1382_v35, %v3820_v16  ;;  %v1263_v19 = vadd.f32 1.0, %v2719_v8  ;;  %v4245_v49 = vld [vmem:[#allocation16_spill] sm:$0xff] }
 0x1c6   :  { %v2723_v9 = vpop.eup %2722  ;;  %v3905_v46 = vmul.f32 0.5, %v749_v52  ;;  %v3907_v40 = vmul.f32 0.5, %v560_v34  ;;  %v1016_v14 = vmul.f32 0.70710677, %v562_v61  ;;  %v1265_v18 = vadd.f32 1.0, %v2721_v32  ;;  %v4248_v32 = vld [vmem:[#allocation17_spill] sm:$0xff] }
 0x1c7   :  { %v2725_v53 = vpop.eup %2724  ;;  %2736 = verf.f32 %v1017_v38  ;;  %v1018_v6 = vmul.f32 0.70710677, %v755_v7  ;;  %1862 = vmatprep.mubr.bf16.mxu0 %v1468_v29  ;;  %2023 = vmatprep.mubr.bf16.mxu1 %v1470_v17  ;;  %v564_v50 = vadd.f32 %v3568_v30, %v3004_v25  ;;  %v1388_v10 = vmul.f32 %v1260_v39, %v3834_v24 }
 0x1c8   :  { %v1390_v16 = vmul.f32 %v1262_v56, %v3844_v54  ;;  %v757_v35 = vadd.f32 %v4245_v49, %v3006_v26  ;;  %v1467_v33 = vpack.c.bf16 %v3825_v2, %v3805_v13  ;;  %v1264_v52 = vadd.f32 1.0, %v2723_v9  ;;  %v4246_v13 = vld [vmem:[#allocation32_spill] sm:$0xff] }
 0x1c9   :  { %v2727_v45 = vpop.eup %2726  ;;  %v3917_v41 = vmul.f32 0.5, %v753_v58  ;;  %2738 = verf.f32 %v1016_v14  ;;  %v1019_v34 = vmul.f32 0.70710677, %v564_v50  ;;  %v1266_v37 = vadd.f32 1.0, %v2725_v53  ;;  %v4247_v58 = vld [vmem:[#allocation33_spill] sm:$0xff] }
 0x1ca   :  { %v2729_v31 = vpop.eup %2728  ;;  %2740 = verf.f32 %v1018_v6  ;;  %v1021_v30 = vmul.f32 0.70710677, %v757_v35  ;;  %1863 = vmatmul.mubr.bf16.gmra.mrb[100].mxu0 %v1467_v33  ;;  %v1469_v24 = vpack.c.bf16 %v3832_v60, %v3810_v12  ;;  %v3922_v54 = vmul.f32 %v1263_v19, %v3846_v22 }
 0x1cb   :  { %v3925_v43 = vmul.f32 %v1265_v18, %v3861_v1  ;;  %v566_v2 = vadd.f32 %v4246_v13, %v3008_v27  ;;  %v759_v20 = vadd.f32 %v4247_v58, %v3010_v0  ;;  %v1267_v8 = vadd.f32 1.0, %v2727_v45  ;;  %v4249_v45 = vld [vmem:[#allocation34_spill] sm:$0xff] }
 0x1cc   :  { %v2731_v21 = vpop.eup %2730  ;;  %v1269_v38 = vadd.f32 1.0, %v2729_v31  ;;  %2742 = verf.f32 %v1019_v34  ;;  %2024 = vmatmul.mubr.bf16.gmra.mrb[100].mxu1 %v1469_v24  ;;  %v570_v12 = vadd.f32 %v3608_v63, %v3004_v25  ;;  %v3933_v22 = vmul.f32 0.5, %v562_v61 }
 0x1cd   :  { %v2733_v60 = vpop.eup %2732  ;;  %2744 = verf.f32 %v1021_v30  ;;  %v1020_v1 = vmul.f32 0.70710677, %v566_v2  ;;  %v763_v39 = vadd.f32 %v4248_v32, %v3006_v26  ;;  %v3938_v29 = vmul.f32 %v1264_v52, %v3876_v59 }
 0x1ce   :  { %v2735_v56 = vpop.eup %2734  ;;  %v3941_v17 = vmul.f32 %v1266_v37, %v3884_v3  ;;  %v890_v9 = vmul.f32 0.5, %v755_v7  ;;  %v1022_v19 = vmul.f32 0.70710677, %v759_v20  ;;  %v1268_v14 = vadd.f32 1.0, %v2731_v21 }
 0x1cf   :  { %v3943_v53 = vmul.f32 0.5, %v564_v50  ;;  %v3945_v63 = vmul.f32 0.5, %v757_v35  ;;  %2746 = verf.f32 %v1020_v1  ;;  %v3948_v61 = vmul.f32 %v1267_v8, %v3886_v55  ;;  %v4250_v35 = vld [vmem:[#allocation35_spill] sm:$0xff] }
 0x1d0   :  { %v3951_v18 = vmul.f32 %v1269_v38, %v3888_v47  ;;  %v3953_v6 = vmul.f32 0.5, %v566_v2  ;;  %v1023_v59 = vmul.f32 0.70710677, %v570_v12  ;;  %v1270_v3 = vadd.f32 1.0, %v2733_v60 }
 0x1d1   :  { %v2737_v49 = vpop.eup %2736  ;;  %v1271_v33 = vadd.f32 1.0, %v2735_v56  ;;  %v1025_v7 = vmul.f32 0.70710677, %v763_v39  ;;  %v572_v50 = vadd.f32 %v4249_v45, %v3008_v27  ;;  %2748 = verf.f32 %v1022_v19  ;;  %v4253_v19 = vld [vmem:[#allocation19_spill] sm:$0xff] }
 0x1d2   :  { %v765_v52 = vadd.f32 %v4250_v35, %v3010_v0  ;;  %v1472_v55 = vpack.c.bf16 %v1388_v10, %v3879_v44  ;;  %v1474_v34 = vpack.c.bf16 %v1390_v16, %v3882_v4  ;;  %v3962_v31 = vmul.f32 %v1268_v14, %v3898_v5  ;;  %v4251_v5 = vld [vmem:[#allocation18_spill] sm:$0xff] }
 0x1d3   :  { %v2739_v47 = vpop.eup %2738  ;;  %v3964_v37 = vmul.f32 0.5, %v759_v20  ;;  %v3966_v30 = vmul.f32 0.5, %v570_v12  ;;  %v1024_v24 = vmul.f32 0.70710677, %v572_v50  ;;  %v1273_v2 = vadd.f32 1.0, %v2737_v49 }
 0x1d4   :  { %v2741_v13 = vpop.eup %2740  ;;  %2750 = verf.f32 %v1023_v59  ;;  %v1026_v58 = vmul.f32 0.70710677, %v765_v52  ;;  %1870 = vmatprep.mubr.bf16.mxu0 %v1472_v55  ;;  %2031 = vmatprep.mubr.bf16.mxu1 %v1474_v34  ;;  %v574_v44 = vadd.f32 %v3630_v28, %v3004_v25  ;;  %v1398_v4 = vmul.f32 %v1270_v3, %v3905_v46  ;;  %v4254_v59 = vld [vmem:[#allocation20_spill] sm:$0xff] }
 0x1d5   :  { %2752 = verf.f32 %v1025_v7  ;;  %v767_v10 = vadd.f32 %v4251_v5, %v3006_v26  ;;  %v1471_v16 = vpack.c.bf16 %v3891_v51, %v3859_v23  ;;  %v3976_v21 = vmul.f32 %v1271_v33, %v3907_v40  ;;  %v4252_v51 = vld [vmem:[#allocation36_spill] sm:$0xff]  ;;  %v4256_v5 = vld [vmem:[#allocation38_spill] sm:$0xff] }
 0x1d6   :  { %v2743_v20 = vpop.eup %2742  ;;  %v1272_v8 = vadd.f32 1.0, %v2739_v47  ;;  %v3978_v38 = vmul.f32 0.5, %v763_v39  ;;  %2754 = verf.f32 %v1024_v24  ;;  %v1274_v60 = vadd.f32 1.0, %v2741_v13  ;;  %v4255_v13 = vld [vmem:[#allocation37_spill] sm:$0xff] }
 0x1d7   :  { %v2745_v12 = vpop.eup %2744  ;;  %2756 = verf.f32 %v1026_v58  ;;  %v1027_v28 = vmul.f32 0.70710677, %v574_v44  ;;  %v1029_v46 = vmul.f32 0.70710677, %v767_v10  ;;  %1871 = vmatmul.mubr.bf16.gmra.mrb[104].mxu0 %v1471_v16  ;;  %v3981_v1 = vmul.f32 %v1273_v2, %v3917_v41 }
 0x1d8   :  { %v1473_v23 = vpack.c.bf16 %v3894_v15, %v3874_v48  ;;  %v576_v40 = vadd.f32 %v4252_v51, %v3008_v27  ;;  %v769_v32 = vadd.f32 %v3639_v36, %v3010_v0  ;;  %v1275_v56 = vadd.f32 1.0, %v2743_v20  ;;  %v4257_v51 = vld [vmem:[#allocation39_spill] sm:$0xff] }
 0x1d9   :  { %v2747_v39 = vpop.eup %2746  ;;  %2758 = verf.f32 %v1027_v28  ;;  %v580_v14 = vadd.f32 %v4253_v19, %v3004_v25  ;;  %v773_v49 = vadd.f32 %v4254_v59, %v3006_v26  ;;  %v1277_v41 = vadd.f32 1.0, %v2745_v12 }
 0x1da   :  { %v3993_v3 = vmul.f32 0.5, %v572_v50  ;;  %2760 = verf.f32 %v1029_v46  ;;  %2032 = vmatmul.mubr.bf16.gmra.mrb[104].mxu1 %v1473_v23  ;;  %v1028_v48 = vmul.f32 0.70710677, %v576_v40  ;;  %v3996_v15 = vmul.f32 %v1272_v8, %v3933_v22 }
 0x1db   :  { %v3998_v33 = vmul.f32 %v1274_v60, %v890_v9  ;;  %v4000_v36 = vmul.f32 0.5, %v765_v52  ;;  %v1030_v7 = vmul.f32 0.70710677, %v769_v32  ;;  %v2749_v45 = vpop.eup %2748  ;;  %v1276_v35 = vadd.f32 1.0, %v2747_v39 }
 0x1dc   :  { %v4002_v55 = vmul.f32 0.5, %v574_v44  ;;  %2762 = verf.f32 %v1028_v48  ;;  %v1031_v34 = vmul.f32 0.70710677, %v580_v14  ;;  %v4005_v50 = vmul.f32 %v1275_v56, %v3943_v53 }
 0x1dd   :  { %v4007_v47 = vmul.f32 0.5, %v767_v10  ;;  %2764 = verf.f32 %v1030_v7  ;;  %v1033_v24 = vmul.f32 0.70710677, %v773_v49  ;;  %v4010_v9 = vmul.f32 %v1277_v41, %v3945_v63 }
 0x1de   :  { %v2751_v22 = vpop.eup %2750  ;;  %v4012_v52 = vmul.f32 0.5, %v576_v40  ;;  %2766 = verf.f32 %v1031_v34  ;;  %v582_v2 = vadd.f32 %v4255_v13, %v3008_v27  ;;  %v1278_v44 = vadd.f32 1.0, %v2749_v45 }
 0x1df   :  { %v2753_v58 = vpop.eup %2752  ;;  %v775_v53 = vadd.f32 %v4256_v5, %v3010_v0  ;;  %v1476_v10 = vpack.c.bf16 %v3962_v31, %v3938_v29  ;;  %v1478_v16 = vpack.c.bf16 %v1398_v4, %v3941_v17  ;;  %v4022_v63 = vmul.f32 %v1276_v35, %v3953_v6  ;;  %v4258_v17 = vld [vmem:[#allocation21_spill] sm:$0xff] }
 0x1e0   :  { %v2755_v20 = vpop.eup %2754  ;;  %v4024_v8 = vmul.f32 0.5, %v769_v32  ;;  %v4026_v12 = vmul.f32 0.5, %v580_v14  ;;  %v1032_v60 = vmul.f32 0.70710677, %v582_v2  ;;  %v1279_v46 = vadd.f32 1.0, %v2751_v22  ;;  %v4260_v22 = vld [vmem:[#allocation22_spill] sm:$0xff] }
 0x1e1   :  { %v2757_v28 = vpop.eup %2756  ;;  %2768 = verf.f32 %v1033_v24  ;;  %v1034_v23 = vmul.f32 0.70710677, %v775_v53  ;;  %1878 = vmatprep.mubr.bf16.mxu0 %v1476_v10  ;;  %2039 = vmatprep.mubr.bf16.mxu1 %v1478_v16  ;;  %v584_v29 = vadd.f32 %v4257_v51, %v3004_v25  ;;  %v1281_v31 = vadd.f32 1.0, %v2753_v58 }
 0x1e2   :  { %2770 = verf.f32 %v1032_v60  ;;  %v777_v6 = vadd.f32 %v4258_v17, %v3006_v26  ;;  %v1475_v4 = vpack.c.bf16 %v3948_v61, %v3922_v54  ;;  %v1406_v32 = vmul.f32 %v1278_v44, %v3964_v37  ;;  %v4259_v54 = vld [vmem:[#allocation40_spill] sm:$0xff] }
 0x1e3   :  { %v2759_v40 = vpop.eup %2758  ;;  %v4035_v39 = vmul.f32 0.5, %v773_v49  ;;  %2772 = verf.f32 %v1034_v23  ;;  %v1035_v56 = vmul.f32 0.70710677, %v584_v29  ;;  %v1280_v14 = vadd.f32 1.0, %v2755_v20 }
 0x1e4   :  { %v2761_v19 = vpop.eup %2760  ;;  %v1282_v59 = vadd.f32 1.0, %v2757_v28  ;;  %v1037_v41 = vmul.f32 0.70710677, %v777_v6  ;;  %1879 = vmatmul.mubr.bf16.gmra.mrb[108].mxu0 %v1475_v4  ;;  %v1477_v48 = vpack.c.bf16 %v3951_v18, %v3925_v43  ;;  %v4040_v7 = vmul.f32 %v1279_v46, %v3966_v30 }
 0x1e5   :  { %2774 = verf.f32 %v1035_v56  ;;  %v586_v61 = vadd.f32 %v4259_v54, %v3008_v27  ;;  %v779_v37 = vadd.f32 %v3698_v62, %v3010_v0  ;;  %v4047_v45 = vmul.f32 %v1281_v31, %v3978_v38 }
 0x1e6   :  { %v2763_v49 = vpop.eup %2762  ;;  %v1283_v35 = vadd.f32 1.0, %v2759_v40  ;;  %2776 = verf.f32 %v1037_v41  ;;  %2040 = vmatmul.mubr.bf16.gmra.mrb[108].mxu1 %v1477_v48  ;;  %v4051_v43 = vadd.f32 %v3721_v57, %v3004_v25  ;;  %v1285_v30 = vadd.f32 1.0, %v2761_v19 }
 0x1e7   :  { %v2765_v18 = vpop.eup %2764  ;;  %v4053_v34 = vmul.f32 0.5, %v582_v2  ;;  %v1036_v24 = vmul.f32 0.70710677, %v586_v61  ;;  %v4057_v13 = vadd.f32 %v4260_v22, %v3006_v26  ;;  %v4060_v38 = vmul.f32 %v1280_v14, %v3993_v3  ;;  %v4262_v14 = vld [vmem:[#allocation24_spill] sm:$0xff] }
 0x1e8   :  { %v2767_v62 = vpop.eup %2766  ;;  %v4063_v58 = vmul.f32 %v1282_v59, %v4000_v36  ;;  %v4065_v44 = vmul.f32 0.5, %v775_v53  ;;  %v1038_v57 = vmul.f32 0.70710677, %v779_v37  ;;  %v1284_v5 = vadd.f32 1.0, %v2763_v49 }
 0x1e9   :  { %v1286_v10 = vadd.f32 1.0, %v2765_v18  ;;  %v907_v16 = vmul.f32 0.5, %v584_v29  ;;  %2778 = verf.f32 %v1036_v24  ;;  %v4068_v2 = vmul.f32 %v1283_v35, %v4002_v55  ;;  %v4261_v55 = vld [vmem:[#allocation23_spill] sm:$0xff]  ;;  %v4264_v35 = vld [vmem:[#allocation26_spill] sm:$0xff] }
 0x1ea   :  { %v909_v20 = vmul.f32 0.5, %v777_v6  ;;  %2780 = verf.f32 %v1038_v57  ;;  %v1039_v60 = vmul.f32 0.70710677, %v4051_v43  ;;  %v4072_v3 = vmul.f32 %v1285_v30, %v4007_v47 }
 0x1eb   :  { %v2769_v28 = vpop.eup %2768  ;;  %v1287_v36 = vadd.f32 1.0, %v2767_v62  ;;  %v1041_v53 = vmul.f32 0.70710677, %v4057_v13  ;;  %v4077_v46 = vadd.f32 %v3734_v42, %v3008_v27  ;;  %v908_v51 = vmul.f32 0.5, %v586_v61 }
 0x1ec   :  { %v2771_v23 = vpop.eup %2770  ;;  %v4081_v29 = vadd.f32 %v4261_v55, %v3010_v0  ;;  %v1480_v31 = vpack.c.bf16 %v4022_v63, %v3996_v15  ;;  %v1482_v17 = vpack.c.bf16 %v1406_v32, %v3998_v33  ;;  %v1412_v6 = vmul.f32 %v1284_v5, %v4012_v52  ;;  %v4263_v52 = vld [vmem:[#allocation25_spill] sm:$0xff] }
 0x1ed   :  { %v2773_v47 = vpop.eup %2772  ;;  %v1414_v4 = vmul.f32 %v1286_v10, %v4024_v8  ;;  %v910_v40 = vmul.f32 0.5, %v779_v37  ;;  %v1040_v42 = vmul.f32 0.70710677, %v4077_v46  ;;  %v1289_v56 = vadd.f32 1.0, %v2769_v28 }
 0x1ee   :  { %2782 = verf.f32 %v1039_v60  ;;  %v1042_v19 = vmul.f32 0.70710677, %v4081_v29  ;;  %1886 = vmatprep.mubr.bf16.mxu0 %v1480_v31  ;;  %2047 = vmatprep.mubr.bf16.mxu1 %v1482_v17  ;;  %v594_v59 = vadd.f32 %v4262_v14, %v3004_v25  ;;  %v4093_v33 = vmul.f32 %v1287_v36, %v4026_v12 }
 0x1ef   :  { %v2775_v15 = vpop.eup %2774  ;;  %2784 = verf.f32 %v1041_v53  ;;  %v787_v63 = vadd.f32 %v4263_v52, %v3006_v26  ;;  %v1479_v8 = vpack.c.bf16 %v4005_v50, %v3976_v21  ;;  %v1288_v41 = vadd.f32 1.0, %v2771_v23 }
 0x1f0   :  { %v2777_v32 = vpop.eup %2776  ;;  %v1290_v48 = vadd.f32 1.0, %v2773_v47  ;;  %v1291_v54 = vadd.f32 1.0, %v2775_v15  ;;  %2786 = verf.f32 %v1040_v42  ;;  %v1043_v37 = vmul.f32 0.70710677, %v594_v59 }
 0x1f1   :  { %v1293_v61 = vadd.f32 1.0, %v2777_v32  ;;  %2788 = verf.f32 %v1042_v19  ;;  %v1045_v25 = vmul.f32 0.70710677, %v787_v63  ;;  %1887 = vmatmul.mubr.bf16.gmra.mrb[112].mxu0 %v1479_v8  ;;  %v1481_v12 = vpack.c.bf16 %v4010_v9, %v3981_v1 }
 0x1f2   :  { %v1419_v49 = vmul.f32 %v1291_v54, %v907_v16  ;;  %v596_v26 = vadd.f32 %v3748_v11, %v3008_v27  ;;  %v789_v21 = vadd.f32 %v4264_v35, %v3010_v0  ;;  %2790 = verf.f32 %v1043_v37 }
 0x1f3   :  { %v2779_v50 = vpop.eup %2778  ;;  %v4105_v18 = vmul.f32 %v1293_v61, %v909_v20  ;;  %v1484_v30 = vpack.c.bf16 %v1412_v6, %v4060_v38  ;;  %v1486_v24 = vpack.c.bf16 %v1414_v4, %v4063_v58  ;;  %v1417_v62 = vmul.f32 %v1289_v56, %v4035_v39  ;;  %2048 = vmatmul.mubr.bf16.gmra.mrb[112].mxu1 %v1481_v12 }
 0x1f4   :  { %v2781_v22 = vpop.eup %2780  ;;  %v1292_v57 = vadd.f32 1.0, %v2779_v50  ;;  %2792 = verf.f32 %v1045_v25  ;;  %v1044_v1 = vmul.f32 0.70710677, %v596_v26  ;;  %v1416_v27 = vmul.f32 %v1288_v41, %v4053_v34 }
 0x1f5   :  { %v1294_v11 = vadd.f32 1.0, %v2781_v22  ;;  %v1046_v9 = vmul.f32 0.70710677, %v789_v21  ;;  %1894 = vmatprep.mubr.bf16.mxu0 %v1484_v30  ;;  %2055 = vmatprep.mubr.bf16.mxu1 %v1486_v24  ;;  %v1483_v0 = vpack.c.bf16 %v4068_v2, %v4040_v7  ;;  %v1418_v38 = vmul.f32 %v1290_v48, %v4065_v44 }
 0x1f6   :  { %v1420_v5 = vmul.f32 %v1292_v57, %v908_v51  ;;  %2794 = verf.f32 %v1044_v1  ;;  %v1485_v39 = vpack.c.bf16 %v4072_v3, %v4047_v45  ;;  %v1487_v10 = vpack.c.bf16 %v1419_v49, %v4093_v33 }
 0x1f7   :  { %v1422_v58 = vmul.f32 %v1294_v11, %v910_v40  ;;  %2796 = verf.f32 %v1046_v9  ;;  %v1489_v34 = vpack.c.bf16 %v4105_v18, %v1417_v62  ;;  %v911_v3 = vmul.f32 0.5, %v4051_v43 }
 0x1f8   :  { %v2783_v16 = vpop.eup %2782  ;;  %v1488_v20 = vpack.c.bf16 %v1420_v5, %v1416_v27  ;;  %v915_v23 = vmul.f32 0.5, %v594_v59  ;;  %v913_v55 = vmul.f32 0.5, %v4057_v13  ;;  %v917_v17 = vmul.f32 0.5, %v787_v63 }
 0x1f9   :  { %v2785_v60 = vpop.eup %2784  ;;  %1895 = vmatmul.mubr.bf16.gmra.mrb[116].mxu0 %v1483_v0  ;;  %v1490_v28 = vpack.c.bf16 %v1422_v58, %v1418_v38  ;;  %v1295_v44 = vadd.f32 1.0, %v2783_v16  ;;  %v912_v40 = vmul.f32 0.5, %v4077_v46  ;;  %v916_v33 = vmul.f32 0.5, %v596_v26 }
 0x1fa   :  { %v2787_v36 = vpop.eup %2786  ;;  %1902 = vmatprep.mubr.bf16.mxu0 %v1488_v20  ;;  %v1297_v53 = vadd.f32 1.0, %v2785_v60  ;;  %v914_v43 = vmul.f32 0.5, %v4081_v29  ;;  %v918_v59 = vmul.f32 0.5, %v789_v21  ;;  %v4125_v29 = vld [vmem:[%s4175_s4] ss:$0 sm:$0xff]  ;;  %s2900_s4 = smov [#allocation8]  }
 0x1fb   :  { %v2789_v7 = vpop.eup %2788  ;;  %2056 = vmatmul.mubr.bf16.gmra.mrb[116].mxu1 %v1485_v39  ;;  %v1296_v31 = vadd.f32 1.0, %v2787_v36  ;;  %v1423_v4 = vmul.f32 %v1295_v44, %v911_v3  ;;  %s2117_s8 = sshll.u32 %s2900_s4, 4  ;;  %s2118_s8 = int_to_ptr.vmem [resolvable:$true] %s2117_s8 }
 0x1fc   :  { %v2791_v2 = vpop.eup %2790  ;;  %2063 = vmatprep.mubr.bf16.mxu1 %v1490_v28  ;;  %v1298_v42 = vadd.f32 1.0, %v2789_v7  ;;  %v1425_v14 = vmul.f32 %v1297_v53, %v913_v55  ;;  %s2864_s9 = scalar_lea.vmem %s2118_s8, 4096  ;;  %p2869_p11 = scmp.lt.s32.totalorder %s2118_s8, %s2118_s8 }
 0x1fd   :  { %v1299_v51 = vadd.f32 1.0, %v2791_v2  ;;  %v1424_v32 = vmul.f32 %v1296_v31, %v912_v40  ;;  %p2865_p10 = scmp.ne.s32.totalorder %s2118_s8, %s2864_s9  ;;  %p2870_p12 = scmp.lt.s32.totalorder %s2864_s9, %s2864_s9 }
 0x1fe   :  { %v2793_v45 = vpop.eup %2792  ;;  %v1426_v48 = vmul.f32 %v1298_v42, %v914_v43 }
 0x1ff   :  { %v1301_v47 = vadd.f32 1.0, %v2793_v45  ;;  %v1427_v56 = vmul.f32 %v1299_v51, %v915_v23  ;;  %p2871_p13 = por %p2870_p12, %p2869_p11 }
 0x200   :  { %v2795_v6 = vpop.eup %2794 }
 0x201   :  { %v2797_v19 = vpop.eup %2796  ;;  %v1429_v15 = vmul.f32 %v1301_v47, %v917_v17  ;;  %v1300_v52 = vadd.f32 1.0, %v2795_v6  ;;  %1903 = vmatmul.mubr.bf16.gmra.mrb[120].mxu0 %v1487_v10  ;;  %v1491_v13 = vpack.c.bf16 %v1427_v56, %v1423_v4  ;;  %p2872_p0 = pnand %p2871_p13, %p2865_p10 }
 0x202   :  { %v1302_v8 = vadd.f32 1.0, %v2797_v19 }
 0x203   :  { %v1428_v63 = vmul.f32 %v1300_v52, %v916_v33  ;;  %v1493_v41 = vpack.c.bf16 %v1429_v15, %v1425_v14  ;;  %2064 = vmatmul.mubr.bf16.gmra.mrb[120].mxu1 %v1489_v34 }
 0x204   :  { %v1430_v54 = vmul.f32 %v1302_v8, %v918_v59 }
 0x205   :  { %v1492_v46 = vpack.c.bf16 %v1428_v63, %v1424_v32 }
 0x206   :  { %v1494_v61 = vpack.c.bf16 %v1430_v54, %v1426_v48 }
 0x207   :  { %1910 = vmatprep.mubr.bf16.mxu0 %v1492_v46 }
 0x208   :  { %2071 = vmatprep.mubr.bf16.mxu1 %v1494_v61 }
 0x209   :  { %1911 = vmatmul.mubr.bf16.gmra.mrb[124].mxu0 %v1491_v13 }
 0x20b   :  { %2072 = vmatmul.mubr.bf16.gmra.mrb[124].mxu1 %v1493_v41 }
 0x224   :  { %v2227_v37 = vpop.f32.mrb[64].mxu0  ;;  %v2339_v25 = vpop.f32.mrb[64].mxu1 }
 0x225   :  { %v2228_v49 = vpop.f32.mrb[65].mxu0  ;;  %v2340_v12 = vpop.f32.mrb[65].mxu1 }
 0x226   :  { %v2229_v26 = vadd.f32 %v2228_v49, %v2227_v37  ;;  %v2341_v35 = vadd.f32 %v2340_v12, %v2339_v25  ;;  %v2230_v21 = vpop.f32.mrb[66].mxu0  ;;  %v2342_v50 = vpop.f32.mrb[66].mxu1 }
 0x227   :  { %v2231_v18 = vpop.f32.mrb[67].mxu0  ;;  %v2343_v30 = vpop.f32.mrb[67].mxu1 }
 0x228   :  { %v1793_v24 = vadd.f32 %v2229_v26, %v4125_v29  ;;  %v2232_v22 = vadd.f32 %v2231_v18, %v2230_v21  ;;  %v2344_v62 = vadd.f32 %v2343_v30, %v2342_v50 }
 0x22a   :  { %v1954_v57 = vadd.f32 %v2341_v35, %v1793_v24  ;;  %v1796_v1 = vadd.f32 %v2232_v22, %v4125_v29 }
 0x22c   :  { %2080 = vst [vmem:[#allocation8] sm:$0xff] %v1954_v57  ;;  %v1957_v27 = vadd.f32 %v2344_v62, %v1796_v1 }
 0x22e   :  { %2081 = vst [vmem:[#allocation8 + $0x8] sm:$0xff] %v1957_v27 }
 0x233   :  { %v2233_v11 = vpop.f32.mrb[68].mxu0 }
 0x234   :  { %v2234_v0 = vpop.f32.mrb[69].mxu0 }
 0x235   :  { %v2345_v9 = vpop.f32.mrb[68].mxu1  ;;  %v2235_v5 = vadd.f32 %v2234_v0, %v2233_v11  ;;  %v2236_v58 = vpop.f32.mrb[70].mxu0 }
 0x236   :  { %v2346_v38 = vpop.f32.mrb[69].mxu1  ;;  %v2237_v34 = vpop.f32.mrb[71].mxu0 }
 0x237   :  { %v2347_v39 = vadd.f32 %v2346_v38, %v2345_v9  ;;  %v2348_v10 = vpop.f32.mrb[70].mxu1  ;;  %v1801_v20 = vadd.f32 %v2235_v5, %v4125_v29  ;;  %v2238_v60 = vadd.f32 %v2237_v34, %v2236_v58 }
 0x238   :  { %v2349_v16 = vpop.f32.mrb[71].mxu1 }
 0x239   :  { %v2350_v28 = vadd.f32 %v2349_v16, %v2348_v10  ;;  %v1962_v36 = vadd.f32 %v2347_v39, %v1801_v20  ;;  %v1804_v7 = vadd.f32 %v2238_v60, %v4125_v29 }
 0x23b   :  { %2082 = vst [vmem:[#allocation8 + $0x10] sm:$0xff] %v1962_v36  ;;  %v1965_v44 = vadd.f32 %v2350_v28, %v1804_v7 }
 0x23d   :  { %2083 = vst [vmem:[#allocation8 + $0x18] sm:$0xff] %v1965_v44 }
 0x242   :  { %v2239_v2 = vpop.f32.mrb[72].mxu0  ;;  %v2351_v53 = vpop.f32.mrb[72].mxu1 }
 0x243   :  { %v2240_v45 = vpop.f32.mrb[73].mxu0  ;;  %v2352_v3 = vpop.f32.mrb[73].mxu1 }
 0x244   :  { %v2241_v23 = vadd.f32 %v2240_v45, %v2239_v2  ;;  %v2353_v51 = vadd.f32 %v2352_v3, %v2351_v53  ;;  %v2242_v55 = vpop.f32.mrb[74].mxu0  ;;  %v2354_v31 = vpop.f32.mrb[74].mxu1 }
 0x245   :  { %v2243_v17 = vpop.f32.mrb[75].mxu0  ;;  %v2355_v47 = vpop.f32.mrb[75].mxu1 }
 0x246   :  { %v1809_v6 = vadd.f32 %v2241_v23, %v4125_v29  ;;  %v2244_v4 = vadd.f32 %v2243_v17, %v2242_v55  ;;  %v2356_v40 = vadd.f32 %v2355_v47, %v2354_v31 }
 0x248   :  { %v1970_v42 = vadd.f32 %v2353_v51, %v1809_v6  ;;  %v1812_v56 = vadd.f32 %v2244_v4, %v4125_v29 }
 0x24a   :  { %2084 = vst [vmem:[#allocation8 + $0x20] sm:$0xff] %v1970_v42  ;;  %v1973_v19 = vadd.f32 %v2356_v40, %v1812_v56 }
 0x24c   :  { %2085 = vst [vmem:[#allocation8 + $0x28] sm:$0xff] %v1973_v19 }
 0x24d   :  { %v2245_v14 = vpop.f32.mrb[76].mxu0  ;;  %v2357_v15 = vpop.f32.mrb[76].mxu1 }
 0x24e   :  { %v2246_v33 = vpop.f32.mrb[77].mxu0  ;;  %v2358_v43 = vpop.f32.mrb[77].mxu1 }
 0x24f   :  { %v2247_v52 = vadd.f32 %v2246_v33, %v2245_v14  ;;  %v2248_v59 = vpop.f32.mrb[78].mxu0  ;;  %v2359_v8 = vadd.f32 %v2358_v43, %v2357_v15  ;;  %v2360_v13 = vpop.f32.mrb[78].mxu1 }
 0x250   :  { %v2249_v32 = vpop.f32.mrb[79].mxu0  ;;  %v2361_v48 = vpop.f32.mrb[79].mxu1 }
 0x251   :  { %v1817_v63 = vadd.f32 %v2247_v52, %v4125_v29  ;;  %v2250_v41 = vadd.f32 %v2249_v32, %v2248_v59  ;;  %v2362_v54 = vadd.f32 %v2361_v48, %v2360_v13 }
 0x253   :  { %v1978_v46 = vadd.f32 %v2359_v8, %v1817_v63  ;;  %v1820_v61 = vadd.f32 %v2250_v41, %v4125_v29 }
 0x255   :  { %2086 = vst [vmem:[#allocation8 + $0x30] sm:$0xff] %v1978_v46  ;;  %v1981_v37 = vadd.f32 %v2362_v54, %v1820_v61 }
 0x257   :  { %2087 = vst [vmem:[#allocation8 + $0x38] sm:$0xff] %v1981_v37 }
 0x25b   :  { %v2251_v25 = vpop.f32.mrb[80].mxu0 }
 0x25c   :  { %v2252_v49 = vpop.f32.mrb[81].mxu0 }
 0x25d   :  { %v2253_v12 = vadd.f32 %v2252_v49, %v2251_v25  ;;  %v2254_v26 = vpop.f32.mrb[82].mxu0 }
 0x25e   :  { %v2363_v35 = vpop.f32.mrb[80].mxu1  ;;  %v2255_v21 = vpop.f32.mrb[83].mxu0 }
 0x25f   :  { %v1825_v50 = vadd.f32 %v2253_v12, %v4125_v29  ;;  %v2364_v18 = vpop.f32.mrb[81].mxu1  ;;  %v2256_v30 = vadd.f32 %v2255_v21, %v2254_v26 }
 0x260   :  { %v2365_v24 = vadd.f32 %v2364_v18, %v2363_v35  ;;  %v2366_v22 = vpop.f32.mrb[82].mxu1 }
 0x261   :  { %v1828_v62 = vadd.f32 %v2256_v30, %v4125_v29  ;;  %v2367_v57 = vpop.f32.mrb[83].mxu1 }
 0x262   :  { %v1986_v1 = vadd.f32 %v2365_v24, %v1825_v50  ;;  %v2368_v27 = vadd.f32 %v2367_v57, %v2366_v22 }
 0x264   :  { %2088 = vst [vmem:[#allocation8 + $0x40] sm:$0xff] %v1986_v1  ;;  %v1989_v11 = vadd.f32 %v2368_v27, %v1828_v62 }
 0x266   :  { %2089 = vst [vmem:[#allocation8 + $0x48] sm:$0xff] %v1989_v11 }
 0x269   :  { %v2257_v9 = vpop.f32.mrb[84].mxu0 }
 0x26a   :  { %v2258_v0 = vpop.f32.mrb[85].mxu0  ;;  %v2369_v39 = vpop.f32.mrb[84].mxu1 }
 0x26b   :  { %v2259_v38 = vadd.f32 %v2258_v0, %v2257_v9  ;;  %v2260_v5 = vpop.f32.mrb[86].mxu0  ;;  %v2370_v34 = vpop.f32.mrb[85].mxu1 }
 0x26c   :  { %v2261_v58 = vpop.f32.mrb[87].mxu0  ;;  %v2371_v20 = vadd.f32 %v2370_v34, %v2369_v39  ;;  %v2372_v60 = vpop.f32.mrb[86].mxu1 }
 0x26d   :  { %v1833_v10 = vadd.f32 %v2259_v38, %v4125_v29  ;;  %v2262_v16 = vadd.f32 %v2261_v58, %v2260_v5  ;;  %v2373_v36 = vpop.f32.mrb[87].mxu1 }
 0x26e   :  { %v2374_v44 = vadd.f32 %v2373_v36, %v2372_v60 }
 0x26f   :  { %v1836_v28 = vadd.f32 %v2262_v16, %v4125_v29  ;;  %v1994_v7 = vadd.f32 %v2371_v20, %v1833_v10 }
 0x271   :  { %2090 = vst [vmem:[#allocation8 + $0x50] sm:$0xff] %v1994_v7  ;;  %v1997_v2 = vadd.f32 %v2374_v44, %v1836_v28 }
 0x273   :  { %2091 = vst [vmem:[#allocation8 + $0x58] sm:$0xff] %v1997_v2 }
 0x276   :  { %v2263_v53 = vpop.f32.mrb[88].mxu0 }
 0x277   :  { %v2264_v45 = vpop.f32.mrb[89].mxu0 }
 0x278   :  { %v2265_v3 = vadd.f32 %v2264_v45, %v2263_v53  ;;  %v2266_v23 = vpop.f32.mrb[90].mxu0 }
 0x279   :  { %v2375_v51 = vpop.f32.mrb[88].mxu1  ;;  %v2267_v55 = vpop.f32.mrb[91].mxu0 }
 0x27a   :  { %v1841_v31 = vadd.f32 %v2265_v3, %v4125_v29  ;;  %v2376_v17 = vpop.f32.mrb[89].mxu1  ;;  %v2268_v47 = vadd.f32 %v2267_v55, %v2266_v23 }
 0x27b   :  { %v2377_v6 = vadd.f32 %v2376_v17, %v2375_v51  ;;  %v2378_v4 = vpop.f32.mrb[90].mxu1 }
 0x27c   :  { %v1844_v40 = vadd.f32 %v2268_v47, %v4125_v29  ;;  %v2379_v42 = vpop.f32.mrb[91].mxu1 }
 0x27d   :  { %v2002_v56 = vadd.f32 %v2377_v6, %v1841_v31  ;;  %v2380_v19 = vadd.f32 %v2379_v42, %v2378_v4 }
 0x27f   :  { %2092 = vst [vmem:[#allocation8 + $0x60] sm:$0xff] %v2002_v56  ;;  %v2005_v14 = vadd.f32 %v2380_v19, %v1844_v40 }
 0x281   :  { %2093 = vst [vmem:[#allocation8 + $0x68] sm:$0xff] %v2005_v14 }
 0x283   :  { %v2269_v15 = vpop.f32.mrb[92].mxu0 }
 0x284   :  { %v2270_v33 = vpop.f32.mrb[93].mxu0 }
 0x285   :  { %v2381_v52 = vpop.f32.mrb[92].mxu1  ;;  %v2271_v43 = vadd.f32 %v2270_v33, %v2269_v15  ;;  %v2272_v59 = vpop.f32.mrb[94].mxu0 }
 0x286   :  { %v2382_v8 = vpop.f32.mrb[93].mxu1  ;;  %v2273_v13 = vpop.f32.mrb[95].mxu0 }
 0x287   :  { %v1849_v32 = vadd.f32 %v2271_v43, %v4125_v29  ;;  %v2383_v63 = vadd.f32 %v2382_v8, %v2381_v52  ;;  %v2384_v41 = vpop.f32.mrb[94].mxu1  ;;  %v2274_v48 = vadd.f32 %v2273_v13, %v2272_v59 }
 0x288   :  { %v2385_v54 = vpop.f32.mrb[95].mxu1 }
 0x289   :  { %v2010_v46 = vadd.f32 %v2383_v63, %v1849_v32  ;;  %v1852_v61 = vadd.f32 %v2274_v48, %v4125_v29  ;;  %v2386_v37 = vadd.f32 %v2385_v54, %v2384_v41 }
 0x28b   :  { %2094 = vst [vmem:[#allocation8 + $0x70] sm:$0xff] %v2010_v46  ;;  %v2013_v25 = vadd.f32 %v2386_v37, %v1852_v61 }
 0x28d   :  { %2095 = vst [vmem:[#allocation8 + $0x78] sm:$0xff] %v2013_v25 }
 0x290   :  { %v2275_v49 = vpop.f32.mrb[96].mxu0 }
 0x291   :  { %v2276_v12 = vpop.f32.mrb[97].mxu0 }
 0x292   :  { %v2277_v26 = vadd.f32 %v2276_v12, %v2275_v49  ;;  %v2278_v35 = vpop.f32.mrb[98].mxu0 }
 0x293   :  { %v2387_v21 = vpop.f32.mrb[96].mxu1  ;;  %v2279_v50 = vpop.f32.mrb[99].mxu0 }
 0x294   :  { %v1857_v18 = vadd.f32 %v2277_v26, %v4125_v29  ;;  %v2388_v30 = vpop.f32.mrb[97].mxu1  ;;  %v2280_v24 = vadd.f32 %v2279_v50, %v2278_v35 }
 0x295   :  { %v2389_v22 = vadd.f32 %v2388_v30, %v2387_v21  ;;  %v2390_v62 = vpop.f32.mrb[98].mxu1 }
 0x296   :  { %v1860_v57 = vadd.f32 %v2280_v24, %v4125_v29  ;;  %v2391_v1 = vpop.f32.mrb[99].mxu1 }
 0x297   :  { %v2018_v27 = vadd.f32 %v2389_v22, %v1857_v18  ;;  %v2392_v11 = vadd.f32 %v2391_v1, %v2390_v62 }
 0x299   :  { %2096 = vst [vmem:[#allocation8 + $0x80] sm:$0xff] %v2018_v27  ;;  %v2021_v9 = vadd.f32 %v2392_v11, %v1860_v57 }
 0x29b   :  { %2097 = vst [vmem:[#allocation8 + $0x88] sm:$0xff] %v2021_v9 }
 0x29d   :  { %v2281_v0 = vpop.f32.mrb[100].mxu0 }
 0x29e   :  { %v2282_v38 = vpop.f32.mrb[101].mxu0 }
 0x29f   :  { %v2393_v5 = vpop.f32.mrb[100].mxu1  ;;  %v2283_v39 = vadd.f32 %v2282_v38, %v2281_v0  ;;  %v2284_v58 = vpop.f32.mrb[102].mxu0 }
 0x2a0   :  { %v2394_v10 = vpop.f32.mrb[101].mxu1  ;;  %v2285_v34 = vpop.f32.mrb[103].mxu0 }
 0x2a1   :  { %v1865_v16 = vadd.f32 %v2283_v39, %v4125_v29  ;;  %v2395_v20 = vadd.f32 %v2394_v10, %v2393_v5  ;;  %v2396_v60 = vpop.f32.mrb[102].mxu1  ;;  %v2286_v28 = vadd.f32 %v2285_v34, %v2284_v58 }
 0x2a2   :  { %v2397_v36 = vpop.f32.mrb[103].mxu1 }
 0x2a3   :  { %v2026_v7 = vadd.f32 %v2395_v20, %v1865_v16  ;;  %v1868_v44 = vadd.f32 %v2286_v28, %v4125_v29  ;;  %v2398_v2 = vadd.f32 %v2397_v36, %v2396_v60 }
 0x2a5   :  { %2098 = vst [vmem:[#allocation8 + $0x90] sm:$0xff] %v2026_v7  ;;  %v2029_v53 = vadd.f32 %v2398_v2, %v1868_v44 }
 0x2a7   :  { %2099 = vst [vmem:[#allocation8 + $0x98] sm:$0xff] %v2029_v53 }
 0x2aa   :  { %v2287_v45 = vpop.f32.mrb[104].mxu0 }
 0x2ab   :  { %v2288_v3 = vpop.f32.mrb[105].mxu0 }
 0x2ac   :  { %v2289_v23 = vadd.f32 %v2288_v3, %v2287_v45  ;;  %v2290_v51 = vpop.f32.mrb[106].mxu0 }
 0x2ad   :  { %v2399_v55 = vpop.f32.mrb[104].mxu1  ;;  %v2291_v31 = vpop.f32.mrb[107].mxu0 }
 0x2ae   :  { %v1873_v17 = vadd.f32 %v2289_v23, %v4125_v29  ;;  %v2400_v47 = vpop.f32.mrb[105].mxu1  ;;  %v2292_v6 = vadd.f32 %v2291_v31, %v2290_v51 }
 0x2af   :  { %v2401_v4 = vadd.f32 %v2400_v47, %v2399_v55  ;;  %v2402_v40 = vpop.f32.mrb[106].mxu1 }
 0x2b0   :  { %v1876_v42 = vadd.f32 %v2292_v6, %v4125_v29  ;;  %v2403_v56 = vpop.f32.mrb[107].mxu1 }
 0x2b1   :  { %v2034_v19 = vadd.f32 %v2401_v4, %v1873_v17  ;;  %v2404_v14 = vadd.f32 %v2403_v56, %v2402_v40 }
 0x2b3   :  { %2100 = vst [vmem:[#allocation8 + $0xa0] sm:$0xff] %v2034_v19  ;;  %v2037_v15 = vadd.f32 %v2404_v14, %v1876_v42 }
 0x2b5   :  { %2101 = vst [vmem:[#allocation8 + $0xa8] sm:$0xff] %v2037_v15 }
 0x2b7   :  { %v2293_v33 = vpop.f32.mrb[108].mxu0 }
 0x2b8   :  { %v2294_v52 = vpop.f32.mrb[109].mxu0 }
 0x2b9   :  { %v2405_v43 = vpop.f32.mrb[108].mxu1  ;;  %v2295_v59 = vadd.f32 %v2294_v52, %v2293_v33  ;;  %v2296_v8 = vpop.f32.mrb[110].mxu0 }
 0x2ba   :  { %v2406_v13 = vpop.f32.mrb[109].mxu1  ;;  %v2297_v32 = vpop.f32.mrb[111].mxu0 }
 0x2bb   :  { %v1881_v63 = vadd.f32 %v2295_v59, %v4125_v29  ;;  %v2407_v41 = vadd.f32 %v2406_v13, %v2405_v43  ;;  %v2408_v48 = vpop.f32.mrb[110].mxu1  ;;  %v2298_v54 = vadd.f32 %v2297_v32, %v2296_v8 }
 0x2bc   :  { %v2409_v46 = vpop.f32.mrb[111].mxu1 }
 0x2bd   :  { %v2042_v61 = vadd.f32 %v2407_v41, %v1881_v63  ;;  %v1884_v37 = vadd.f32 %v2298_v54, %v4125_v29  ;;  %v2410_v25 = vadd.f32 %v2409_v46, %v2408_v48 }
 0x2bf   :  { %2102 = vst [vmem:[#allocation8 + $0xb0] sm:$0xff] %v2042_v61  ;;  %v2045_v49 = vadd.f32 %v2410_v25, %v1884_v37 }
 0x2c1   :  { %2103 = vst [vmem:[#allocation8 + $0xb8] sm:$0xff] %v2045_v49 }
 0x2c4   :  { %v2299_v12 = vpop.f32.mrb[112].mxu0 }
 0x2c5   :  { %v2300_v26 = vpop.f32.mrb[113].mxu0 }
 0x2c6   :  { %v2301_v35 = vadd.f32 %v2300_v26, %v2299_v12  ;;  %v2302_v21 = vpop.f32.mrb[114].mxu0  ;;  %v2411_v50 = vpop.f32.mrb[112].mxu1 }
 0x2c7   :  { %v2303_v18 = vpop.f32.mrb[115].mxu0  ;;  %v2412_v24 = vpop.f32.mrb[113].mxu1 }
 0x2c8   :  { %v1889_v30 = vadd.f32 %v2301_v35, %v4125_v29  ;;  %v2304_v22 = vadd.f32 %v2303_v18, %v2302_v21  ;;  %v2413_v62 = vadd.f32 %v2412_v24, %v2411_v50  ;;  %v2414_v57 = vpop.f32.mrb[114].mxu1 }
 0x2c9   :  { %v2415_v27 = vpop.f32.mrb[115].mxu1 }
 0x2ca   :  { %v1892_v1 = vadd.f32 %v2304_v22, %v4125_v29  ;;  %v2050_v11 = vadd.f32 %v2413_v62, %v1889_v30  ;;  %v2416_v9 = vadd.f32 %v2415_v27, %v2414_v57 }
 0x2cc   :  { %v2305_v0 = vpop.f32.mrb[116].mxu0  ;;  %2104 = vst [vmem:[#allocation8 + $0xc0] sm:$0xff] %v2050_v11  ;;  %v2053_v38 = vadd.f32 %v2416_v9, %v1892_v1 }
 0x2cd   :  { %v2306_v5 = vpop.f32.mrb[117].mxu0 }
 0x2ce   :  { %v2307_v39 = vadd.f32 %v2306_v5, %v2305_v0  ;;  %v2308_v58 = vpop.f32.mrb[118].mxu0  ;;  %2105 = vst [vmem:[#allocation8 + $0xc8] sm:$0xff] %v2053_v38  ;;  %v2417_v10 = vpop.f32.mrb[116].mxu1 }
 0x2cf   :  { %v2309_v34 = vpop.f32.mrb[119].mxu0  ;;  %v2418_v20 = vpop.f32.mrb[117].mxu1 }
 0x2d0   :  { %v1897_v16 = vadd.f32 %v2307_v39, %v4125_v29  ;;  %v2310_v60 = vadd.f32 %v2309_v34, %v2308_v58  ;;  %v2419_v28 = vadd.f32 %v2418_v20, %v2417_v10  ;;  %v2420_v36 = vpop.f32.mrb[118].mxu1 }
 0x2d1   :  { %v2421_v44 = vpop.f32.mrb[119].mxu1 }
 0x2d2   :  { %v1900_v7 = vadd.f32 %v2310_v60, %v4125_v29  ;;  %v2058_v2 = vadd.f32 %v2419_v28, %v1897_v16  ;;  %v2422_v53 = vadd.f32 %v2421_v44, %v2420_v36 }
 0x2d4   :  { %v2311_v45 = vpop.f32.mrb[120].mxu0  ;;  %2106 = vst [vmem:[#allocation8 + $0xd0] sm:$0xff] %v2058_v2  ;;  %v2061_v3 = vadd.f32 %v2422_v53, %v1900_v7 }
 0x2d5   :  { %v2312_v23 = vpop.f32.mrb[121].mxu0 }
 0x2d6   :  { %v2313_v51 = vadd.f32 %v2312_v23, %v2311_v45  ;;  %v2314_v55 = vpop.f32.mrb[122].mxu0  ;;  %2107 = vst [vmem:[#allocation8 + $0xd8] sm:$0xff] %v2061_v3  ;;  %v2423_v31 = vpop.f32.mrb[120].mxu1 }
 0x2d7   :  { %v2315_v17 = vpop.f32.mrb[123].mxu0  ;;  %v2424_v6 = vpop.f32.mrb[121].mxu1 }
 0x2d8   :  { %v1905_v47 = vadd.f32 %v2313_v51, %v4125_v29  ;;  %v2316_v4 = vadd.f32 %v2315_v17, %v2314_v55  ;;  %v2425_v40 = vadd.f32 %v2424_v6, %v2423_v31  ;;  %v2426_v42 = vpop.f32.mrb[122].mxu1 }
 0x2d9   :  { %v2427_v19 = vpop.f32.mrb[123].mxu1 }
 0x2da   :  { %v1908_v56 = vadd.f32 %v2316_v4, %v4125_v29  ;;  %v2066_v14 = vadd.f32 %v2425_v40, %v1905_v47  ;;  %v2428_v15 = vadd.f32 %v2427_v19, %v2426_v42 }
 0x2dc   :  { %v2317_v33 = vpop.f32.mrb[124].mxu0  ;;  %2108 = vst [vmem:[#allocation8 + $0xe0] sm:$0xff] %v2066_v14  ;;  %v2069_v52 = vadd.f32 %v2428_v15, %v1908_v56 }
 0x2dd   :  { %v2318_v43 = vpop.f32.mrb[125].mxu0 }
 0x2de   :  { %v2319_v59 = vadd.f32 %v2318_v43, %v2317_v33  ;;  %v2320_v8 = vpop.f32.mrb[126].mxu0  ;;  %2109 = vst [vmem:[#allocation8 + $0xe8] sm:$0xff] %v2069_v52  ;;  %v2429_v13 = vpop.f32.mrb[124].mxu1 }
 0x2df   :  { %v2321_v32 = vpop.f32.mrb[127].mxu0  ;;  %v2430_v41 = vpop.f32.mrb[125].mxu1 }
 0x2e0   :  { %v1913_v63 = vadd.f32 %v2319_v59, %v4125_v29  ;;  %v2322_v48 = vadd.f32 %v2321_v32, %v2320_v8  ;;  %v2431_v54 = vadd.f32 %v2430_v41, %v2429_v13  ;;  %v2432_v46 = vpop.f32.mrb[126].mxu1 }
 0x2e1   :  { %v2433_v37 = vpop.f32.mrb[127].mxu1 }
 0x2e2   :  { %v1916_v61 = vadd.f32 %v2322_v48, %v4125_v29  ;;  %v2074_v25 = vadd.f32 %v2431_v54, %v1913_v63  ;;  %v2434_v49 = vadd.f32 %v2433_v37, %v2432_v46 }
 0x2e4   :  { %2110 = vst [vmem:[#allocation8 + $0xf0] sm:$0xff] %v2074_v25  ;;  %v2077_v12 = vadd.f32 %v2434_v49, %v1916_v61 }
 0x2e6   :  { %2111 = vst [vmem:[#allocation8 + $0xf8] sm:$0xff] %v2077_v12 }
 0x2e7   :  { %2875 = shalt.err (!%p2872_p0)
}
 0x2e8   :  { %s2876_s12 = scalar_lea.hbm %s4176_s5, 4096 }
 0x2e9   :  { %p2877_p1 = scmp.ne.s32.totalorder %s4176_s5, %s2876_s12  ;;  %p2880_p2 = scmp.lt.u32.totalorder %s2876_s12, %s4176_s5 }
 0x2eb   :  { %p2882_p3 = pnand %p2880_p2, %p2877_p1 }
 0x2ed   :  { %2885 = shalt.err (!%p2882_p3)
}
 0x2ee   :  { %s2901_s1 = smov 128   ;;  %s2902_s17 = smov 8  }
 0x2ef   :  { %2123 = dma.vmem_to_hbm [thread:$0]  %s2118_s8, 4096, %s4176_s5, [#allocation4], %s2901_s1, %s2901_s1, %s2902_s17  }
 0x2f0   :  { %2890 = dma.done.wait [#allocation4], 4096  }
 0x2f1   :  { %2891 = vsyncadd [#allocation4], 4294963200 }
 0x2f2   :  { %2127 = vsyncpa [#allocation3], 1 }
 0x2f3   :  { %2128 = vsyncpa [#allocation6], 1 }
 0x2f4   :  { %2129 = vsyncpa [#allocation4], 1 }

</bundles_post_ra>
